<compile_context>
chip_gen: v7x
topology: tpu7x:2x2x1
jax: 0.10.0
libtpu: 0.0.40
codegen_flags: <defaults>
</compile_context>

<pallas_src>
import jax
import jax.numpy as jnp
from jax.experimental import pallas as pl
from jax.experimental.pallas import tpu as pltpu  # noqa: F401  (TPU backend)


def _decoder_kernel(
    emb_ref,    # (T, H)      f32  pre-gathered embedding rows (one per step)
    hid0_ref,   # (1, H)      f32  initial hidden state
    enc_ref,    # (L, H)      f32  encoder outputs
    wA_ref,     # (2H, L+3H)  f32  fused [attn | hidden-path GRU] weight
    wC_ref,     # (2H, H)     f32  attn_combine weight
    wI_ref,     # (H, 3H)     f32  GRU input-path weight (gate order [r, z, n])
    wO_ref,     # (H, V)      f32  output projection weight
    bA_ref,     # (1, L+3H)   f32  fused [b_attn | b_hh] bias
    bC_ref,     # (1, H)      f32  attn_combine bias
    bI_ref,     # (1, 3H)     f32  GRU input-path bias
    bO_ref,     # (1, V)      f32  output projection bias
    out_ref,    # (T, OUT_W)  f32  per-step merged rows [logp | attn_w | hidden | pad]
):
    T = out_ref.shape[0]
    H = hid0_ref.shape[-1]
    L = enc_ref.shape[0]
    V = wO_ref.shape[-1]
    OUT_W = out_ref.shape[-1]

    # Hoist every weight / bias load above the step loop (loaded once, vreg/VMEM
    # resident for all T steps).
    w_A = wA_ref[...]
    w_C = wC_ref[...]
    w_I = wI_ref[...]
    w_O = wO_ref[...]
    b_A = bA_ref[...]
    b_C = bC_ref[...]
    b_I = bI_ref[...]
    b_O = bO_ref[...]
    enc = enc_ref[...]

    pad_w = OUT_W - (V + L + H)
    pad = jnp.zeros((1, pad_w), jnp.float32) if pad_w > 0 else None

    def step_fn(t, hid):
        emb = emb_ref[pl.ds(t, 1), :]                         # (1, H)
        # TODO(synk): nn.Dropout(p=0.1) is identity here (eval-mode semantics).

        # ---- fused stage-A: [attn scores | GRU hidden-path gates] ----------
        eh = jnp.concatenate([emb, hid], axis=-1)             # (1, 2H)
        fused = jnp.dot(eh, w_A,
                        preferred_element_type=jnp.float32) + b_A   # (1, L+3H)
        scores = fused[:, 0:L]                                # (1, L)
        gh = fused[:, L:L + 3 * H]                            # (1, 3H) = hid@w_hh + b_hh

        # ---- attention softmax (exact; user-visible output) ----------------
        s_max = jnp.max(scores, axis=-1, keepdims=True)
        e = jnp.exp(scores - s_max)
        attn_w = e / jnp.sum(e, axis=-1, keepdims=True)       # (1, L)

        # ---- context: attn_weights @ encoder_outputs (bmm with batch=1) ----
        ctx = jnp.dot(attn_w, enc,
                      preferred_element_type=jnp.float32)     # (1, H)

        # ---- attn_combine(cat(emb, ctx)) + ReLU -----------------------------
        ec = jnp.concatenate([emb, ctx], axis=-1)             # (1, 2H)
        x = jnp.maximum(
            jnp.dot(ec, w_C, preferred_element_type=jnp.float32) + b_C, 0.0)

        # ---- GRU cell, input-path gates then gate math ----------------------
        gi = jnp.dot(x, w_I,
                     preferred_element_type=jnp.float32) + b_I       # (1, 3H)
        rz = jax.nn.sigmoid(gi[:, 0:2 * H] + gh[:, 0:2 * H])          # (1, 2H)
        r = rz[:, 0:H]
        z = rz[:, H:2 * H]
        n = jnp.tanh(gi[:, 2 * H:3 * H] + r * gh[:, 2 * H:3 * H])
        h_new = (1.0 - z) * n + z * hid                                # (1, H)

        # ---- output projection + log-softmax (exact) -------------------------
        logits = jnp.dot(h_new, w_O,
                         preferred_element_type=jnp.float32) + b_O     # (1, V)
        m = jnp.max(logits, axis=-1, keepdims=True)
        sh = logits - m
        lse = jnp.log(jnp.sum(jnp.exp(sh), axis=-1, keepdims=True))
        logp = sh - lse

        # ---- stage one lane-dense (1, 128) row into the VMEM output block ---
        pieces = [logp, attn_w, h_new] + ([pad] if pad is not None else [])
        out_ref[pl.ds(t, 1), :] = jnp.concatenate(pieces, axis=-1)
        return h_new

    jax.lax.fori_loop(0, T, step_fn, hid0_ref[...], unroll=True)


def attn_decoder_forward(tokens, hidden, encoder_outputs, params):
    """Runs len(tokens) teacher-forced decode steps in one pallas_call.

    tokens: (T,) int32; hidden: (1,1,H) f32; encoder_outputs: (L,H) f32.
    Returns (log_probs (T,V), final_hidden (1,1,H), attn_weights (T,L)).
    For T == 1 this is exactly the PyTorch module's forward.
    """
    T = int(tokens.shape[0])
    H = hidden.shape[-1]
    L = encoder_outputs.shape[0]
    V = params["w_out"].shape[-1]
    OUT_W = ((V + L + H + 127) // 128) * 128

    # Pre-gather embedding rows in the wrapper (no per-step token-indexed DMA).
    emb_rows = jnp.take(params["embedding"], tokens.astype(jnp.int32), axis=0)
    hid_2d = hidden.reshape(1, H).astype(jnp.float32)

    out = pl.pallas_call(
        _decoder_kernel,
        out_shape=jax.ShapeDtypeStruct((T, OUT_W), jnp.float32),
    )(
        emb_rows.astype(jnp.float32),
        hid_2d,
        encoder_outputs.astype(jnp.float32),
        params["w_A"], params["w_comb"], params["w_ih"], params["w_out"],
        params["b_A"], params["b_comb"], params["b_ih"], params["b_out"],
    )

    logp = out[:, 0:V]
    attn_w = out[:, V:V + L]
    final_hidden = out[T - 1, V + L:V + L + H].reshape(1, 1, H)
    return logp, final_hidden, attn_w


def init_params(key, hidden_size, output_size, max_length):
    """Builds PyTorch-equivalent parameters, pre-fused for the kernel (all f32)."""
    H, V, L = hidden_size, output_size, max_length
    ks = jax.random.split(key, 12)
    u = lambda k, shape, scale: jax.random.uniform(
        k, shape, jnp.float32, minval=-scale, maxval=scale)

    emb = jax.random.normal(ks[0], (V, H), jnp.float32)
    # attn: Linear(2H -> L), rows ordered [emb | hid]
    w_attn = u(ks[1], (2 * H, L), (2 * H) ** -0.5)
    b_attn = u(ks[2], (1, L), (2 * H) ** -0.5)
    # attn_combine: Linear(2H -> H), rows ordered [emb | ctx]
    w_comb = u(ks[3], (2 * H, H), (2 * H) ** -0.5)
    b_comb = u(ks[4], (1, H), (2 * H) ** -0.5)
    # GRU(H -> H), gate order [r, z, n]
    w_ih = u(ks[5], (H, 3 * H), H ** -0.5)
    b_ih = u(ks[6], (1, 3 * H), H ** -0.5)
    w_hh = u(ks[7], (H, 3 * H), H ** -0.5)
    b_hh = u(ks[8], (1, 3 * H), H ** -0.5)
    # out: Linear(H -> V)
    w_out = u(ks[9], (H, V), H ** -0.5)
    b_out = u(ks[10], (1, V), H ** -0.5)

    # Fused stage-A weight: [emb|hid] @ w_A = [attn scores | hid@w_hh].
    # Only the hidden-state rows feed the GRU hidden-path gates.
    w_A = jnp.concatenate(
        [w_attn,
         jnp.concatenate([jnp.zeros((H, 3 * H), jnp.float32), w_hh], axis=0)],
        axis=1)                                              # (2H, L + 3H)
    b_A = jnp.concatenate([b_attn, b_hh], axis=1)            # (1, L + 3H)

    return {
        "embedding": emb,
        "w_A": w_A, "b_A": b_A,
        "w_comb": w_comb, "b_comb": b_comb,
        "w_ih": w_ih, "b_ih": b_ih,
        "w_out": w_out, "b_out": b_out,
    }


def _reference_decode(tokens, hidden, encoder_outputs, params):
    """Pure-JAX reference using the UNFUSED PyTorch-style math (all f32)."""
    H = hidden.shape[-1]
    L = encoder_outputs.shape[0]
    V = params["w_out"].shape[-1]
    emb_table = params["embedding"]
    w_A, b_A = params["w_A"], params["b_A"]
    w_attn, b_attn = w_A[:, 0:L], b_A[:, 0:L]
    w_hh, b_hh = w_A[H:, L:], b_A[:, L:]
    w_comb, b_comb = params["w_comb"], params["b_comb"]
    w_ih, b_ih = params["w_ih"], params["b_ih"]
    w_out, b_out = params["w_out"], params["b_out"]

    hid = hidden.reshape(1, H).astype(jnp.float32)
    logps, attns = [], []
    for t in range(int(tokens.shape[0])):
        e = emb_table[tokens[t]][None, :]
        eh = jnp.concatenate([e, hid], -1)
        attn_w = jax.nn.softmax(eh @ w_attn + b_attn, axis=-1)
        ctx = attn_w @ encoder_outputs
        x = jnp.maximum(jnp.concatenate([e, ctx], -1) @ w_comb + b_comb, 0.0)
        gi = x @ w_ih + b_ih
        gh = hid @ w_hh + b_hh
        i_r, i_z, i_n = gi[:, 0:H], gi[:, H:2 * H], gi[:, 2 * H:]
        h_r, h_z, h_n = gh[:, 0:H], gh[:, H:2 * H], gh[:, 2 * H:]
        r = jax.nn.sigmoid(i_r + h_r)
        z = jax.nn.sigmoid(i_z + h_z)
        n = jnp.tanh(i_n + r * h_n)
        hid = (1.0 - z) * n + z * hid
        logps.append(jax.nn.log_softmax(hid @ w_out + b_out, axis=-1))
        attns.append(attn_w)
    return jnp.concatenate(logps, 0), hid.reshape(1, 1, H), jnp.concatenate(attns, 0)


if __name__ == "__main__":
    hidden_size = 32
    output_size = 24
    max_length = 12
    num_steps = 5          # teacher-forced decode steps, all inside one pallas_call

    key = jax.random.PRNGKey(0)
    k_param, k_hid, k_enc = jax.random.split(key, 3)

    params = init_params(k_param, hidden_size, output_size, max_length)
    tokens = jnp.array([3, 1, 7, 0, 11], dtype=jnp.int32)
    hidden = jax.random.normal(k_hid, (1, 1, hidden_size), jnp.float32)
    encoder_outputs = jax.random.normal(k_enc, (max_length, hidden_size), jnp.float32)

    logp, new_hidden, attn_weights = attn_decoder_forward(
        tokens, hidden, encoder_outputs, params)
    jax.block_until_ready((logp, new_hidden, attn_weights))

    assert logp.shape == (num_steps, output_size)
    assert new_hidden.shape == (1, 1, hidden_size)
    assert attn_weights.shape == (num_steps, max_length)

    # correctness vs the unfused pure-JAX reference (all f32)
    logp_ref, hid_ref, attn_ref = _reference_decode(
        tokens, hidden, encoder_outputs, params)
    assert float(jnp.max(jnp.abs(logp - logp_ref))) < 2e-2
    assert float(jnp.max(jnp.abs(new_hidden - hid_ref))) < 2e-2
    assert float(jnp.max(jnp.abs(attn_weights - attn_ref))) < 2e-2
    # attention weights are an exact softmax -> rows sum to ~1
    assert float(jnp.max(jnp.abs(jnp.sum(attn_weights, -1) - 1.0))) < 1e-5

    print("KERNEL_OK")
</pallas_src>

<mosaic_0001>
module attributes {stable_mosaic.version = 11 : i64} {
  func.func @_decoder_kernel(%arg0: memref<5x32xf32, #tpu.memory_space<vmem>>, %arg1: memref<1x32xf32, #tpu.memory_space<vmem>>, %arg2: memref<12x32xf32, #tpu.memory_space<vmem>>, %arg3: memref<64x108xf32, #tpu.memory_space<vmem>>, %arg4: memref<64x32xf32, #tpu.memory_space<vmem>>, %arg5: memref<32x96xf32, #tpu.memory_space<vmem>>, %arg6: memref<32x24xf32, #tpu.memory_space<vmem>>, %arg7: memref<1x108xf32, #tpu.memory_space<vmem>>, %arg8: memref<1x32xf32, #tpu.memory_space<vmem>>, %arg9: memref<1x96xf32, #tpu.memory_space<vmem>>, %arg10: memref<1x24xf32, #tpu.memory_space<vmem>>, %arg11: memref<5x128xf32, #tpu.memory_space<vmem>>) attributes {dimension_semantics = [], scalar_prefetch = 0 : i64, scratch_operands = 0 : i64, tpu.core_type = #tpu.core_type<tc>} {
    %c0 = arith.constant 0 : index
    %c0_0 = arith.constant 0 : index
    %0 = vector.load %arg3[%c0, %c0_0] : memref<64x108xf32, #tpu.memory_space<vmem>>, vector<64x108xf32>
    %c0_1 = arith.constant 0 : index
    %c0_2 = arith.constant 0 : index
    %1 = vector.load %arg4[%c0_1, %c0_2] : memref<64x32xf32, #tpu.memory_space<vmem>>, vector<64x32xf32>
    %c0_3 = arith.constant 0 : index
    %c0_4 = arith.constant 0 : index
    %2 = vector.load %arg5[%c0_3, %c0_4] : memref<32x96xf32, #tpu.memory_space<vmem>>, vector<32x96xf32>
    %c0_5 = arith.constant 0 : index
    %c0_6 = arith.constant 0 : index
    %3 = vector.load %arg6[%c0_5, %c0_6] : memref<32x24xf32, #tpu.memory_space<vmem>>, vector<32x24xf32>
    %c0_7 = arith.constant 0 : index
    %c0_8 = arith.constant 0 : index
    %4 = vector.load %arg7[%c0_7, %c0_8] : memref<1x108xf32, #tpu.memory_space<vmem>>, vector<1x108xf32>
    %c0_9 = arith.constant 0 : index
    %c0_10 = arith.constant 0 : index
    %5 = vector.load %arg8[%c0_9, %c0_10] : memref<1x32xf32, #tpu.memory_space<vmem>>, vector<1x32xf32>
    %c0_11 = arith.constant 0 : index
    %c0_12 = arith.constant 0 : index
    %6 = vector.load %arg9[%c0_11, %c0_12] : memref<1x96xf32, #tpu.memory_space<vmem>>, vector<1x96xf32>
    %c0_13 = arith.constant 0 : index
    %c0_14 = arith.constant 0 : index
    %7 = vector.load %arg10[%c0_13, %c0_14] : memref<1x24xf32, #tpu.memory_space<vmem>>, vector<1x24xf32>
    %c0_15 = arith.constant 0 : index
    %c0_16 = arith.constant 0 : index
    %8 = vector.load %arg2[%c0_15, %c0_16] : memref<12x32xf32, #tpu.memory_space<vmem>>, vector<12x32xf32>
    %cst = arith.constant 0.000000e+00 : f32
    %9 = vector.broadcast %cst : f32 to vector<1x60xf32>
    %c0_17 = arith.constant 0 : index
    %c0_18 = arith.constant 0 : index
    %10 = vector.load %arg1[%c0_17, %c0_18] : memref<1x32xf32, #tpu.memory_space<vmem>>, vector<1x32xf32>
    %c0_i32 = arith.constant 0 : i32
    %11 = arith.index_cast %c0_i32 : i32 to index
    %c0_19 = arith.constant 0 : index
    %12 = vector.load %arg0[%11, %c0_19] : memref<5x32xf32, #tpu.memory_space<vmem>>, vector<1x32xf32>
    %13 = tpu.concatenate %12, %10 in 1 : vector<1x32xf32>, vector<1x32xf32> -> vector<1x64xf32>
    %cst_20 = arith.constant dense<0.000000e+00> : vector<1x108xf32>
    %14 = tpu.matmul %13, %0, %cst_20 {dimension_numbers = #tpu.dot_dimension_numbers<[1], [0], [0], [1], [0, 0, 1, 1], [], []>} : vector<1x64xf32>, vector<64x108xf32>, vector<1x108xf32> -> vector<1x108xf32>
    %15 = arith.addf %14, %4 : vector<1x108xf32>
    %16 = vector.extract_strided_slice %15 {offsets = [0, 0], sizes = [1, 12], strides = [1, 1]} : vector<1x108xf32> to vector<1x12xf32>
    %17 = vector.extract_strided_slice %15 {offsets = [0, 12], sizes = [1, 96], strides = [1, 1]} : vector<1x108xf32> to vector<1x96xf32>
    %cst_21 = arith.constant dense<0xFF800000> : vector<1xf32>
    %18 = vector.multi_reduction <maximumf>, %16, %cst_21 [1] : vector<1x12xf32> to vector<1xf32>
    %19 = vector.shape_cast %18 : vector<1xf32> to vector<1x1xf32>
    %20 = vector.broadcast %19 : vector<1x1xf32> to vector<1x12xf32>
    %21 = arith.subf %16, %20 : vector<1x12xf32>
    %22 = math.exp %21 : vector<1x12xf32>
    %cst_22 = arith.constant dense<0.000000e+00> : vector<1xf32>
    %23 = vector.multi_reduction <add>, %22, %cst_22 [1] : vector<1x12xf32> to vector<1xf32>
    %24 = vector.shape_cast %23 : vector<1xf32> to vector<1x1xf32>
    %25 = vector.broadcast %24 : vector<1x1xf32> to vector<1x12xf32>
    %26 = arith.divf %22, %25 : vector<1x12xf32>
    %cst_23 = arith.constant dense<0.000000e+00> : vector<1x32xf32>
    %27 = tpu.matmul %26, %8, %cst_23 {dimension_numbers = #tpu.dot_dimension_numbers<[1], [0], [0], [1], [0, 0, 1, 1], [], []>} : vector<1x12xf32>, vector<12x32xf32>, vector<1x32xf32> -> vector<1x32xf32>
    %28 = tpu.concatenate %12, %27 in 1 : vector<1x32xf32>, vector<1x32xf32> -> vector<1x64xf32>
    %cst_24 = arith.constant dense<0.000000e+00> : vector<1x32xf32>
    %29 = tpu.matmul %28, %1, %cst_24 {dimension_numbers = #tpu.dot_dimension_numbers<[1], [0], [0], [1], [0, 0, 1, 1], [], []>} : vector<1x64xf32>, vector<64x32xf32>, vector<1x32xf32> -> vector<1x32xf32>
    %30 = arith.addf %29, %5 : vector<1x32xf32>
    %cst_25 = arith.constant 0.000000e+00 : f32
    %31 = vector.broadcast %cst_25 : f32 to vector<1x32xf32>
    %32 = arith.maximumf %30, %31 : vector<1x32xf32>
    %cst_26 = arith.constant dense<0.000000e+00> : vector<1x96xf32>
    %33 = tpu.matmul %32, %2, %cst_26 {dimension_numbers = #tpu.dot_dimension_numbers<[1], [0], [0], [1], [0, 0, 1, 1], [], []>} : vector<1x32xf32>, vector<32x96xf32>, vector<1x96xf32> -> vector<1x96xf32>
    %34 = arith.addf %33, %6 : vector<1x96xf32>
    %35 = vector.extract_strided_slice %34 {offsets = [0, 0], sizes = [1, 64], strides = [1, 1]} : vector<1x96xf32> to vector<1x64xf32>
    %36 = vector.extract_strided_slice %17 {offsets = [0, 0], sizes = [1, 64], strides = [1, 1]} : vector<1x96xf32> to vector<1x64xf32>
    %37 = arith.addf %35, %36 : vector<1x64xf32>
    %38 = arith.negf %37 : vector<1x64xf32>
    %39 = math.exp %38 : vector<1x64xf32>
    %cst_27 = arith.constant 1.000000e+00 : f32
    %40 = vector.broadcast %cst_27 : f32 to vector<1x64xf32>
    %41 = arith.addf %40, %39 : vector<1x64xf32>
    %42 = arith.divf %40, %41 : vector<1x64xf32>
    %43 = vector.extract_strided_slice %42 {offsets = [0, 0], sizes = [1, 32], strides = [1, 1]} : vector<1x64xf32> to vector<1x32xf32>
    %44 = vector.extract_strided_slice %42 {offsets = [0, 32], sizes = [1, 32], strides = [1, 1]} : vector<1x64xf32> to vector<1x32xf32>
    %45 = vector.extract_strided_slice %34 {offsets = [0, 64], sizes = [1, 32], strides = [1, 1]} : vector<1x96xf32> to vector<1x32xf32>
    %46 = vector.extract_strided_slice %17 {offsets = [0, 64], sizes = [1, 32], strides = [1, 1]} : vector<1x96xf32> to vector<1x32xf32>
    %47 = arith.mulf %43, %46 : vector<1x32xf32>
    %48 = arith.addf %45, %47 : vector<1x32xf32>
    %49 = math.tanh %48 : vector<1x32xf32>
    %cst_28 = arith.constant 1.000000e+00 : f32
    %50 = vector.broadcast %cst_28 : f32 to vector<1x32xf32>
    %51 = arith.subf %50, %44 : vector<1x32xf32>
    %52 = arith.mulf %51, %49 : vector<1x32xf32>
    %53 = arith.mulf %44, %10 : vector<1x32xf32>
    %54 = arith.addf %52, %53 : vector<1x32xf32>
    %cst_29 = arith.constant dense<0.000000e+00> : vector<1x24xf32>
    %55 = tpu.matmul %54, %3, %cst_29 {dimension_numbers = #tpu.dot_dimension_numbers<[1], [0], [0], [1], [0, 0, 1, 1], [], []>} : vector<1x32xf32>, vector<32x24xf32>, vector<1x24xf32> -> vector<1x24xf32>
    %56 = arith.addf %55, %7 : vector<1x24xf32>
    %cst_30 = arith.constant dense<0xFF800000> : vector<1xf32>
    %57 = vector.multi_reduction <maximumf>, %56, %cst_30 [1] : vector<1x24xf32> to vector<1xf32>
    %58 = vector.shape_cast %57 : vector<1xf32> to vector<1x1xf32>
    %59 = vector.broadcast %58 : vector<1x1xf32> to vector<1x24xf32>
    %60 = arith.subf %56, %59 : vector<1x24xf32>
    %61 = math.exp %60 : vector<1x24xf32>
    %cst_31 = arith.constant dense<0.000000e+00> : vector<1xf32>
    %62 = vector.multi_reduction <add>, %61, %cst_31 [1] : vector<1x24xf32> to vector<1xf32>
    %63 = vector.shape_cast %62 : vector<1xf32> to vector<1x1xf32>
    %64 = math.log %63 : vector<1x1xf32>
    %65 = vector.broadcast %64 : vector<1x1xf32> to vector<1x24xf32>
    %66 = arith.subf %60, %65 : vector<1x24xf32>
    %67 = tpu.concatenate %66, %26, %54, %9 in 1 : vector<1x24xf32>, vector<1x12xf32>, vector<1x32xf32>, vector<1x60xf32> -> vector<1x128xf32>
    %68 = arith.index_cast %c0_i32 : i32 to index
    %c0_32 = arith.constant 0 : index
    %69 = vector.load %arg11[%68, %c0_32] : memref<5x128xf32, #tpu.memory_space<vmem>>, vector<1x128xf32>
    tpu.vector_store %arg11[%68, %c0_32], %67 {strides = array<i32>} : memref<5x128xf32, #tpu.memory_space<vmem>>, vector<1x128xf32>,
    %c1_i32 = arith.constant 1 : i32
    %70 = arith.index_cast %c1_i32 : i32 to index
    %c0_33 = arith.constant 0 : index
    %71 = vector.load %arg0[%70, %c0_33] : memref<5x32xf32, #tpu.memory_space<vmem>>, vector<1x32xf32>
    %72 = tpu.concatenate %71, %54 in 1 : vector<1x32xf32>, vector<1x32xf32> -> vector<1x64xf32>
    %cst_34 = arith.constant dense<0.000000e+00> : vector<1x108xf32>
    %73 = tpu.matmul %72, %0, %cst_34 {dimension_numbers = #tpu.dot_dimension_numbers<[1], [0], [0], [1], [0, 0, 1, 1], [], []>} : vector<1x64xf32>, vector<64x108xf32>, vector<1x108xf32> -> vector<1x108xf32>
    %74 = arith.addf %73, %4 : vector<1x108xf32>
    %75 = vector.extract_strided_slice %74 {offsets = [0, 0], sizes = [1, 12], strides = [1, 1]} : vector<1x108xf32> to vector<1x12xf32>
    %76 = vector.extract_strided_slice %74 {offsets = [0, 12], sizes = [1, 96], strides = [1, 1]} : vector<1x108xf32> to vector<1x96xf32>
    %cst_35 = arith.constant dense<0xFF800000> : vector<1xf32>
    %77 = vector.multi_reduction <maximumf>, %75, %cst_35 [1] : vector<1x12xf32> to vector<1xf32>
    %78 = vector.shape_cast %77 : vector<1xf32> to vector<1x1xf32>
    %79 = vector.broadcast %78 : vector<1x1xf32> to vector<1x12xf32>
    %80 = arith.subf %75, %79 : vector<1x12xf32>
    %81 = math.exp %80 : vector<1x12xf32>
    %cst_36 = arith.constant dense<0.000000e+00> : vector<1xf32>
    %82 = vector.multi_reduction <add>, %81, %cst_36 [1] : vector<1x12xf32> to vector<1xf32>
    %83 = vector.shape_cast %82 : vector<1xf32> to vector<1x1xf32>
    %84 = vector.broadcast %83 : vector<1x1xf32> to vector<1x12xf32>
    %85 = arith.divf %81, %84 : vector<1x12xf32>
    %cst_37 = arith.constant dense<0.000000e+00> : vector<1x32xf32>
    %86 = tpu.matmul %85, %8, %cst_37 {dimension_numbers = #tpu.dot_dimension_numbers<[1], [0], [0], [1], [0, 0, 1, 1], [], []>} : vector<1x12xf32>, vector<12x32xf32>, vector<1x32xf32> -> vector<1x32xf32>
    %87 = tpu.concatenate %71, %86 in 1 : vector<1x32xf32>, vector<1x32xf32> -> vector<1x64xf32>
    %cst_38 = arith.constant dense<0.000000e+00> : vector<1x32xf32>
    %88 = tpu.matmul %87, %1, %cst_38 {dimension_numbers = #tpu.dot_dimension_numbers<[1], [0], [0], [1], [0, 0, 1, 1], [], []>} : vector<1x64xf32>, vector<64x32xf32>, vector<1x32xf32> -> vector<1x32xf32>
    %89 = arith.addf %88, %5 : vector<1x32xf32>
    %cst_39 = arith.constant 0.000000e+00 : f32
    %90 = vector.broadcast %cst_39 : f32 to vector<1x32xf32>
    %91 = arith.maximumf %89, %90 : vector<1x32xf32>
    %cst_40 = arith.constant dense<0.000000e+00> : vector<1x96xf32>
    %92 = tpu.matmul %91, %2, %cst_40 {dimension_numbers = #tpu.dot_dimension_numbers<[1], [0], [0], [1], [0, 0, 1, 1], [], []>} : vector<1x32xf32>, vector<32x96xf32>, vector<1x96xf32> -> vector<1x96xf32>
    %93 = arith.addf %92, %6 : vector<1x96xf32>
    %94 = vector.extract_strided_slice %93 {offsets = [0, 0], sizes = [1, 64], strides = [1, 1]} : vector<1x96xf32> to vector<1x64xf32>
    %95 = vector.extract_strided_slice %76 {offsets = [0, 0], sizes = [1, 64], strides = [1, 1]} : vector<1x96xf32> to vector<1x64xf32>
    %96 = arith.addf %94, %95 : vector<1x64xf32>
    %97 = arith.negf %96 : vector<1x64xf32>
    %98 = math.exp %97 : vector<1x64xf32>
    %cst_41 = arith.constant 1.000000e+00 : f32
    %99 = vector.broadcast %cst_41 : f32 to vector<1x64xf32>
    %100 = arith.addf %99, %98 : vector<1x64xf32>
    %101 = arith.divf %99, %100 : vector<1x64xf32>
    %102 = vector.extract_strided_slice %101 {offsets = [0, 0], sizes = [1, 32], strides = [1, 1]} : vector<1x64xf32> to vector<1x32xf32>
    %103 = vector.extract_strided_slice %101 {offsets = [0, 32], sizes = [1, 32], strides = [1, 1]} : vector<1x64xf32> to vector<1x32xf32>
    %104 = vector.extract_strided_slice %93 {offsets = [0, 64], sizes = [1, 32], strides = [1, 1]} : vector<1x96xf32> to vector<1x32xf32>
    %105 = vector.extract_strided_slice %76 {offsets = [0, 64], sizes = [1, 32], strides = [1, 1]} : vector<1x96xf32> to vector<1x32xf32>
    %106 = arith.mulf %102, %105 : vector<1x32xf32>
    %107 = arith.addf %104, %106 : vector<1x32xf32>
    %108 = math.tanh %107 : vector<1x32xf32>
    %cst_42 = arith.constant 1.000000e+00 : f32
    %109 = vector.broadcast %cst_42 : f32 to vector<1x32xf32>
    %110 = arith.subf %109, %103 : vector<1x32xf32>
    %111 = arith.mulf %110, %108 : vector<1x32xf32>
    %112 = arith.mulf %103, %54 : vector<1x32xf32>
    %113 = arith.addf %111, %112 : vector<1x32xf32>
    %cst_43 = arith.constant dense<0.000000e+00> : vector<1x24xf32>
    %114 = tpu.matmul %113, %3, %cst_43 {dimension_numbers = #tpu.dot_dimension_numbers<[1], [0], [0], [1], [0, 0, 1, 1], [], []>} : vector<1x32xf32>, vector<32x24xf32>, vector<1x24xf32> -> vector<1x24xf32>
    %115 = arith.addf %114, %7 : vector<1x24xf32>
    %cst_44 = arith.constant dense<0xFF800000> : vector<1xf32>
    %116 = vector.multi_reduction <maximumf>, %115, %cst_44 [1] : vector<1x24xf32> to vector<1xf32>
    %117 = vector.shape_cast %116 : vector<1xf32> to vector<1x1xf32>
    %118 = vector.broadcast %117 : vector<1x1xf32> to vector<1x24xf32>
    %119 = arith.subf %115, %118 : vector<1x24xf32>
    %120 = math.exp %119 : vector<1x24xf32>
    %cst_45 = arith.constant dense<0.000000e+00> : vector<1xf32>
    %121 = vector.multi_reduction <add>, %120, %cst_45 [1] : vector<1x24xf32> to vector<1xf32>
    %122 = vector.shape_cast %121 : vector<1xf32> to vector<1x1xf32>
    %123 = math.log %122 : vector<1x1xf32>
    %124 = vector.broadcast %123 : vector<1x1xf32> to vector<1x24xf32>
    %125 = arith.subf %119, %124 : vector<1x24xf32>
    %126 = tpu.concatenate %125, %85, %113, %9 in 1 : vector<1x24xf32>, vector<1x12xf32>, vector<1x32xf32>, vector<1x60xf32> -> vector<1x128xf32>
    %127 = arith.index_cast %c1_i32 : i32 to index
    %c0_46 = arith.constant 0 : index
    %128 = vector.load %arg11[%127, %c0_46] : memref<5x128xf32, #tpu.memory_space<vmem>>, vector<1x128xf32>
    tpu.vector_store %arg11[%127, %c0_46], %126 {strides = array<i32>} : memref<5x128xf32, #tpu.memory_space<vmem>>, vector<1x128xf32>,
    %c2_i32 = arith.constant 2 : i32
    %129 = arith.index_cast %c2_i32 : i32 to index
    %c0_47 = arith.constant 0 : index
    %130 = vector.load %arg0[%129, %c0_47] : memref<5x32xf32, #tpu.memory_space<vmem>>, vector<1x32xf32>
    %131 = tpu.concatenate %130, %113 in 1 : vector<1x32xf32>, vector<1x32xf32> -> vector<1x64xf32>
    %cst_48 = arith.constant dense<0.000000e+00> : vector<1x108xf32>
    %132 = tpu.matmul %131, %0, %cst_48 {dimension_numbers = #tpu.dot_dimension_numbers<[1], [0], [0], [1], [0, 0, 1, 1], [], []>} : vector<1x64xf32>, vector<64x108xf32>, vector<1x108xf32> -> vector<1x108xf32>
    %133 = arith.addf %132, %4 : vector<1x108xf32>
    %134 = vector.extract_strided_slice %133 {offsets = [0, 0], sizes = [1, 12], strides = [1, 1]} : vector<1x108xf32> to vector<1x12xf32>
    %135 = vector.extract_strided_slice %133 {offsets = [0, 12], sizes = [1, 96], strides = [1, 1]} : vector<1x108xf32> to vector<1x96xf32>
    %cst_49 = arith.constant dense<0xFF800000> : vector<1xf32>
    %136 = vector.multi_reduction <maximumf>, %134, %cst_49 [1] : vector<1x12xf32> to vector<1xf32>
    %137 = vector.shape_cast %136 : vector<1xf32> to vector<1x1xf32>
    %138 = vector.broadcast %137 : vector<1x1xf32> to vector<1x12xf32>
    %139 = arith.subf %134, %138 : vector<1x12xf32>
    %140 = math.exp %139 : vector<1x12xf32>
    %cst_50 = arith.constant dense<0.000000e+00> : vector<1xf32>
    %141 = vector.multi_reduction <add>, %140, %cst_50 [1] : vector<1x12xf32> to vector<1xf32>
    %142 = vector.shape_cast %141 : vector<1xf32> to vector<1x1xf32>
    %143 = vector.broadcast %142 : vector<1x1xf32> to vector<1x12xf32>
    %144 = arith.divf %140, %143 : vector<1x12xf32>
    %cst_51 = arith.constant dense<0.000000e+00> : vector<1x32xf32>
    %145 = tpu.matmul %144, %8, %cst_51 {dimension_numbers = #tpu.dot_dimension_numbers<[1], [0], [0], [1], [0, 0, 1, 1], [], []>} : vector<1x12xf32>, vector<12x32xf32>, vector<1x32xf32> -> vector<1x32xf32>
    %146 = tpu.concatenate %130, %145 in 1 : vector<1x32xf32>, vector<1x32xf32> -> vector<1x64xf32>
    %cst_52 = arith.constant dense<0.000000e+00> : vector<1x32xf32>
    %147 = tpu.matmul %146, %1, %cst_52 {dimension_numbers = #tpu.dot_dimension_numbers<[1], [0], [0], [1], [0, 0, 1, 1], [], []>} : vector<1x64xf32>, vector<64x32xf32>, vector<1x32xf32> -> vector<1x32xf32>
    %148 = arith.addf %147, %5 : vector<1x32xf32>
    %cst_53 = arith.constant 0.000000e+00 : f32
    %149 = vector.broadcast %cst_53 : f32 to vector<1x32xf32>
    %150 = arith.maximumf %148, %149 : vector<1x32xf32>
    %cst_54 = arith.constant dense<0.000000e+00> : vector<1x96xf32>
    %151 = tpu.matmul %150, %2, %cst_54 {dimension_numbers = #tpu.dot_dimension_numbers<[1], [0], [0], [1], [0, 0, 1, 1], [], []>} : vector<1x32xf32>, vector<32x96xf32>, vector<1x96xf32> -> vector<1x96xf32>
    %152 = arith.addf %151, %6 : vector<1x96xf32>
    %153 = vector.extract_strided_slice %152 {offsets = [0, 0], sizes = [1, 64], strides = [1, 1]} : vector<1x96xf32> to vector<1x64xf32>
    %154 = vector.extract_strided_slice %135 {offsets = [0, 0], sizes = [1, 64], strides = [1, 1]} : vector<1x96xf32> to vector<1x64xf32>
    %155 = arith.addf %153, %154 : vector<1x64xf32>
    %156 = arith.negf %155 : vector<1x64xf32>
    %157 = math.exp %156 : vector<1x64xf32>
    %cst_55 = arith.constant 1.000000e+00 : f32
    %158 = vector.broadcast %cst_55 : f32 to vector<1x64xf32>
    %159 = arith.addf %158, %157 : vector<1x64xf32>
    %160 = arith.divf %158, %159 : vector<1x64xf32>
    %161 = vector.extract_strided_slice %160 {offsets = [0, 0], sizes = [1, 32], strides = [1, 1]} : vector<1x64xf32> to vector<1x32xf32>
    %162 = vector.extract_strided_slice %160 {offsets = [0, 32], sizes = [1, 32], strides = [1, 1]} : vector<1x64xf32> to vector<1x32xf32>
    %163 = vector.extract_strided_slice %152 {offsets = [0, 64], sizes = [1, 32], strides = [1, 1]} : vector<1x96xf32> to vector<1x32xf32>
    %164 = vector.extract_strided_slice %135 {offsets = [0, 64], sizes = [1, 32], strides = [1, 1]} : vector<1x96xf32> to vector<1x32xf32>
    %165 = arith.mulf %161, %164 : vector<1x32xf32>
    %166 = arith.addf %163, %165 : vector<1x32xf32>
    %167 = math.tanh %166 : vector<1x32xf32>
    %cst_56 = arith.constant 1.000000e+00 : f32
    %168 = vector.broadcast %cst_56 : f32 to vector<1x32xf32>
    %169 = arith.subf %168, %162 : vector<1x32xf32>
    %170 = arith.mulf %169, %167 : vector<1x32xf32>
    %171 = arith.mulf %162, %113 : vector<1x32xf32>
    %172 = arith.addf %170, %171 : vector<1x32xf32>
    %cst_57 = arith.constant dense<0.000000e+00> : vector<1x24xf32>
    %173 = tpu.matmul %172, %3, %cst_57 {dimension_numbers = #tpu.dot_dimension_numbers<[1], [0], [0], [1], [0, 0, 1, 1], [], []>} : vector<1x32xf32>, vector<32x24xf32>, vector<1x24xf32> -> vector<1x24xf32>
    %174 = arith.addf %173, %7 : vector<1x24xf32>
    %cst_58 = arith.constant dense<0xFF800000> : vector<1xf32>
    %175 = vector.multi_reduction <maximumf>, %174, %cst_58 [1] : vector<1x24xf32> to vector<1xf32>
    %176 = vector.shape_cast %175 : vector<1xf32> to vector<1x1xf32>
    %177 = vector.broadcast %176 : vector<1x1xf32> to vector<1x24xf32>
    %178 = arith.subf %174, %177 : vector<1x24xf32>
    %179 = math.exp %178 : vector<1x24xf32>
    %cst_59 = arith.constant dense<0.000000e+00> : vector<1xf32>
    %180 = vector.multi_reduction <add>, %179, %cst_59 [1] : vector<1x24xf32> to vector<1xf32>
    %181 = vector.shape_cast %180 : vector<1xf32> to vector<1x1xf32>
    %182 = math.log %181 : vector<1x1xf32>
    %183 = vector.broadcast %182 : vector<1x1xf32> to vector<1x24xf32>
    %184 = arith.subf %178, %183 : vector<1x24xf32>
    %185 = tpu.concatenate %184, %144, %172, %9 in 1 : vector<1x24xf32>, vector<1x12xf32>, vector<1x32xf32>, vector<1x60xf32> -> vector<1x128xf32>
    %186 = arith.index_cast %c2_i32 : i32 to index
    %c0_60 = arith.constant 0 : index
    %187 = vector.load %arg11[%186, %c0_60] : memref<5x128xf32, #tpu.memory_space<vmem>>, vector<1x128xf32>
    tpu.vector_store %arg11[%186, %c0_60], %185 {strides = array<i32>} : memref<5x128xf32, #tpu.memory_space<vmem>>, vector<1x128xf32>,
    %c3_i32 = arith.constant 3 : i32
    %188 = arith.index_cast %c3_i32 : i32 to index
    %c0_61 = arith.constant 0 : index
    %189 = vector.load %arg0[%188, %c0_61] : memref<5x32xf32, #tpu.memory_space<vmem>>, vector<1x32xf32>
    %190 = tpu.concatenate %189, %172 in 1 : vector<1x32xf32>, vector<1x32xf32> -> vector<1x64xf32>
    %cst_62 = arith.constant dense<0.000000e+00> : vector<1x108xf32>
    %191 = tpu.matmul %190, %0, %cst_62 {dimension_numbers = #tpu.dot_dimension_numbers<[1], [0], [0], [1], [0, 0, 1, 1], [], []>} : vector<1x64xf32>, vector<64x108xf32>, vector<1x108xf32> -> vector<1x108xf32>
    %192 = arith.addf %191, %4 : vector<1x108xf32>
    %193 = vector.extract_strided_slice %192 {offsets = [0, 0], sizes = [1, 12], strides = [1, 1]} : vector<1x108xf32> to vector<1x12xf32>
    %194 = vector.extract_strided_slice %192 {offsets = [0, 12], sizes = [1, 96], strides = [1, 1]} : vector<1x108xf32> to vector<1x96xf32>
    %cst_63 = arith.constant dense<0xFF800000> : vector<1xf32>
    %195 = vector.multi_reduction <maximumf>, %193, %cst_63 [1] : vector<1x12xf32> to vector<1xf32>
    %196 = vector.shape_cast %195 : vector<1xf32> to vector<1x1xf32>
    %197 = vector.broadcast %196 : vector<1x1xf32> to vector<1x12xf32>
    %198 = arith.subf %193, %197 : vector<1x12xf32>
    %199 = math.exp %198 : vector<1x12xf32>
    %cst_64 = arith.constant dense<0.000000e+00> : vector<1xf32>
    %200 = vector.multi_reduction <add>, %199, %cst_64 [1] : vector<1x12xf32> to vector<1xf32>
    %201 = vector.shape_cast %200 : vector<1xf32> to vector<1x1xf32>
    %202 = vector.broadcast %201 : vector<1x1xf32> to vector<1x12xf32>
    %203 = arith.divf %199, %202 : vector<1x12xf32>
    %cst_65 = arith.constant dense<0.000000e+00> : vector<1x32xf32>
    %204 = tpu.matmul %203, %8, %cst_65 {dimension_numbers = #tpu.dot_dimension_numbers<[1], [0], [0], [1], [0, 0, 1, 1], [], []>} : vector<1x12xf32>, vector<12x32xf32>, vector<1x32xf32> -> vector<1x32xf32>
    %205 = tpu.concatenate %189, %204 in 1 : vector<1x32xf32>, vector<1x32xf32> -> vector<1x64xf32>
    %cst_66 = arith.constant dense<0.000000e+00> : vector<1x32xf32>
    %206 = tpu.matmul %205, %1, %cst_66 {dimension_numbers = #tpu.dot_dimension_numbers<[1], [0], [0], [1], [0, 0, 1, 1], [], []>} : vector<1x64xf32>, vector<64x32xf32>, vector<1x32xf32> -> vector<1x32xf32>
    %207 = arith.addf %206, %5 : vector<1x32xf32>
    %cst_67 = arith.constant 0.000000e+00 : f32
    %208 = vector.broadcast %cst_67 : f32 to vector<1x32xf32>
    %209 = arith.maximumf %207, %208 : vector<1x32xf32>
    %cst_68 = arith.constant dense<0.000000e+00> : vector<1x96xf32>
    %210 = tpu.matmul %209, %2, %cst_68 {dimension_numbers = #tpu.dot_dimension_numbers<[1], [0], [0], [1], [0, 0, 1, 1], [], []>} : vector<1x32xf32>, vector<32x96xf32>, vector<1x96xf32> -> vector<1x96xf32>
    %211 = arith.addf %210, %6 : vector<1x96xf32>
    %212 = vector.extract_strided_slice %211 {offsets = [0, 0], sizes = [1, 64], strides = [1, 1]} : vector<1x96xf32> to vector<1x64xf32>
    %213 = vector.extract_strided_slice %194 {offsets = [0, 0], sizes = [1, 64], strides = [1, 1]} : vector<1x96xf32> to vector<1x64xf32>
    %214 = arith.addf %212, %213 : vector<1x64xf32>
    %215 = arith.negf %214 : vector<1x64xf32>
    %216 = math.exp %215 : vector<1x64xf32>
    %cst_69 = arith.constant 1.000000e+00 : f32
    %217 = vector.broadcast %cst_69 : f32 to vector<1x64xf32>
    %218 = arith.addf %217, %216 : vector<1x64xf32>
    %219 = arith.divf %217, %218 : vector<1x64xf32>
    %220 = vector.extract_strided_slice %219 {offsets = [0, 0], sizes = [1, 32], strides = [1, 1]} : vector<1x64xf32> to vector<1x32xf32>
    %221 = vector.extract_strided_slice %219 {offsets = [0, 32], sizes = [1, 32], strides = [1, 1]} : vector<1x64xf32> to vector<1x32xf32>
    %222 = vector.extract_strided_slice %211 {offsets = [0, 64], sizes = [1, 32], strides = [1, 1]} : vector<1x96xf32> to vector<1x32xf32>
    %223 = vector.extract_strided_slice %194 {offsets = [0, 64], sizes = [1, 32], strides = [1, 1]} : vector<1x96xf32> to vector<1x32xf32>
    %224 = arith.mulf %220, %223 : vector<1x32xf32>
    %225 = arith.addf %222, %224 : vector<1x32xf32>
    %226 = math.tanh %225 : vector<1x32xf32>
    %cst_70 = arith.constant 1.000000e+00 : f32
    %227 = vector.broadcast %cst_70 : f32 to vector<1x32xf32>
    %228 = arith.subf %227, %221 : vector<1x32xf32>
    %229 = arith.mulf %228, %226 : vector<1x32xf32>
    %230 = arith.mulf %221, %172 : vector<1x32xf32>
    %231 = arith.addf %229, %230 : vector<1x32xf32>
    %cst_71 = arith.constant dense<0.000000e+00> : vector<1x24xf32>
    %232 = tpu.matmul %231, %3, %cst_71 {dimension_numbers = #tpu.dot_dimension_numbers<[1], [0], [0], [1], [0, 0, 1, 1], [], []>} : vector<1x32xf32>, vector<32x24xf32>, vector<1x24xf32> -> vector<1x24xf32>
    %233 = arith.addf %232, %7 : vector<1x24xf32>
    %cst_72 = arith.constant dense<0xFF800000> : vector<1xf32>
    %234 = vector.multi_reduction <maximumf>, %233, %cst_72 [1] : vector<1x24xf32> to vector<1xf32>
    %235 = vector.shape_cast %234 : vector<1xf32> to vector<1x1xf32>
    %236 = vector.broadcast %235 : vector<1x1xf32> to vector<1x24xf32>
    %237 = arith.subf %233, %236 : vector<1x24xf32>
    %238 = math.exp %237 : vector<1x24xf32>
    %cst_73 = arith.constant dense<0.000000e+00> : vector<1xf32>
    %239 = vector.multi_reduction <add>, %238, %cst_73 [1] : vector<1x24xf32> to vector<1xf32>
    %240 = vector.shape_cast %239 : vector<1xf32> to vector<1x1xf32>
    %241 = math.log %240 : vector<1x1xf32>
    %242 = vector.broadcast %241 : vector<1x1xf32> to vector<1x24xf32>
    %243 = arith.subf %237, %242 : vector<1x24xf32>
    %244 = tpu.concatenate %243, %203, %231, %9 in 1 : vector<1x24xf32>, vector<1x12xf32>, vector<1x32xf32>, vector<1x60xf32> -> vector<1x128xf32>
    %245 = arith.index_cast %c3_i32 : i32 to index
    %c0_74 = arith.constant 0 : index
    %246 = vector.load %arg11[%245, %c0_74] : memref<5x128xf32, #tpu.memory_space<vmem>>, vector<1x128xf32>
    tpu.vector_store %arg11[%245, %c0_74], %244 {strides = array<i32>} : memref<5x128xf32, #tpu.memory_space<vmem>>, vector<1x128xf32>,
    %c4_i32 = arith.constant 4 : i32
    %247 = arith.index_cast %c4_i32 : i32 to index
    %c0_75 = arith.constant 0 : index
    %248 = vector.load %arg0[%247, %c0_75] : memref<5x32xf32, #tpu.memory_space<vmem>>, vector<1x32xf32>
    %249 = tpu.concatenate %248, %231 in 1 : vector<1x32xf32>, vector<1x32xf32> -> vector<1x64xf32>
    %cst_76 = arith.constant dense<0.000000e+00> : vector<1x108xf32>
    %250 = tpu.matmul %249, %0, %cst_76 {dimension_numbers = #tpu.dot_dimension_numbers<[1], [0], [0], [1], [0, 0, 1, 1], [], []>} : vector<1x64xf32>, vector<64x108xf32>, vector<1x108xf32> -> vector<1x108xf32>
    %251 = arith.addf %250, %4 : vector<1x108xf32>
    %252 = vector.extract_strided_slice %251 {offsets = [0, 0], sizes = [1, 12], strides = [1, 1]} : vector<1x108xf32> to vector<1x12xf32>
    %253 = vector.extract_strided_slice %251 {offsets = [0, 12], sizes = [1, 96], strides = [1, 1]} : vector<1x108xf32> to vector<1x96xf32>
    %cst_77 = arith.constant dense<0xFF800000> : vector<1xf32>
    %254 = vector.multi_reduction <maximumf>, %252, %cst_77 [1] : vector<1x12xf32> to vector<1xf32>
    %255 = vector.shape_cast %254 : vector<1xf32> to vector<1x1xf32>
    %256 = vector.broadcast %255 : vector<1x1xf32> to vector<1x12xf32>
    %257 = arith.subf %252, %256 : vector<1x12xf32>
    %258 = math.exp %257 : vector<1x12xf32>
    %cst_78 = arith.constant dense<0.000000e+00> : vector<1xf32>
    %259 = vector.multi_reduction <add>, %258, %cst_78 [1] : vector<1x12xf32> to vector<1xf32>
    %260 = vector.shape_cast %259 : vector<1xf32> to vector<1x1xf32>
    %261 = vector.broadcast %260 : vector<1x1xf32> to vector<1x12xf32>
    %262 = arith.divf %258, %261 : vector<1x12xf32>
    %cst_79 = arith.constant dense<0.000000e+00> : vector<1x32xf32>
    %263 = tpu.matmul %262, %8, %cst_79 {dimension_numbers = #tpu.dot_dimension_numbers<[1], [0], [0], [1], [0, 0, 1, 1], [], []>} : vector<1x12xf32>, vector<12x32xf32>, vector<1x32xf32> -> vector<1x32xf32>
    %264 = tpu.concatenate %248, %263 in 1 : vector<1x32xf32>, vector<1x32xf32> -> vector<1x64xf32>
    %cst_80 = arith.constant dense<0.000000e+00> : vector<1x32xf32>
    %265 = tpu.matmul %264, %1, %cst_80 {dimension_numbers = #tpu.dot_dimension_numbers<[1], [0], [0], [1], [0, 0, 1, 1], [], []>} : vector<1x64xf32>, vector<64x32xf32>, vector<1x32xf32> -> vector<1x32xf32>
    %266 = arith.addf %265, %5 : vector<1x32xf32>
    %cst_81 = arith.constant 0.000000e+00 : f32
    %267 = vector.broadcast %cst_81 : f32 to vector<1x32xf32>
    %268 = arith.maximumf %266, %267 : vector<1x32xf32>
    %cst_82 = arith.constant dense<0.000000e+00> : vector<1x96xf32>
    %269 = tpu.matmul %268, %2, %cst_82 {dimension_numbers = #tpu.dot_dimension_numbers<[1], [0], [0], [1], [0, 0, 1, 1], [], []>} : vector<1x32xf32>, vector<32x96xf32>, vector<1x96xf32> -> vector<1x96xf32>
    %270 = arith.addf %269, %6 : vector<1x96xf32>
    %271 = vector.extract_strided_slice %270 {offsets = [0, 0], sizes = [1, 64], strides = [1, 1]} : vector<1x96xf32> to vector<1x64xf32>
    %272 = vector.extract_strided_slice %253 {offsets = [0, 0], sizes = [1, 64], strides = [1, 1]} : vector<1x96xf32> to vector<1x64xf32>
    %273 = arith.addf %271, %272 : vector<1x64xf32>
    %274 = arith.negf %273 : vector<1x64xf32>
    %275 = math.exp %274 : vector<1x64xf32>
    %cst_83 = arith.constant 1.000000e+00 : f32
    %276 = vector.broadcast %cst_83 : f32 to vector<1x64xf32>
    %277 = arith.addf %276, %275 : vector<1x64xf32>
    %278 = arith.divf %276, %277 : vector<1x64xf32>
    %279 = vector.extract_strided_slice %278 {offsets = [0, 0], sizes = [1, 32], strides = [1, 1]} : vector<1x64xf32> to vector<1x32xf32>
    %280 = vector.extract_strided_slice %278 {offsets = [0, 32], sizes = [1, 32], strides = [1, 1]} : vector<1x64xf32> to vector<1x32xf32>
    %281 = vector.extract_strided_slice %270 {offsets = [0, 64], sizes = [1, 32], strides = [1, 1]} : vector<1x96xf32> to vector<1x32xf32>
    %282 = vector.extract_strided_slice %253 {offsets = [0, 64], sizes = [1, 32], strides = [1, 1]} : vector<1x96xf32> to vector<1x32xf32>
    %283 = arith.mulf %279, %282 : vector<1x32xf32>
    %284 = arith.addf %281, %283 : vector<1x32xf32>
    %285 = math.tanh %284 : vector<1x32xf32>
    %cst_84 = arith.constant 1.000000e+00 : f32
    %286 = vector.broadcast %cst_84 : f32 to vector<1x32xf32>
    %287 = arith.subf %286, %280 : vector<1x32xf32>
    %288 = arith.mulf %287, %285 : vector<1x32xf32>
    %289 = arith.mulf %280, %231 : vector<1x32xf32>
    %290 = arith.addf %288, %289 : vector<1x32xf32>
    %cst_85 = arith.constant dense<0.000000e+00> : vector<1x24xf32>
    %291 = tpu.matmul %290, %3, %cst_85 {dimension_numbers = #tpu.dot_dimension_numbers<[1], [0], [0], [1], [0, 0, 1, 1], [], []>} : vector<1x32xf32>, vector<32x24xf32>, vector<1x24xf32> -> vector<1x24xf32>
    %292 = arith.addf %291, %7 : vector<1x24xf32>
    %cst_86 = arith.constant dense<0xFF800000> : vector<1xf32>
    %293 = vector.multi_reduction <maximumf>, %292, %cst_86 [1] : vector<1x24xf32> to vector<1xf32>
    %294 = vector.shape_cast %293 : vector<1xf32> to vector<1x1xf32>
    %295 = vector.broadcast %294 : vector<1x1xf32> to vector<1x24xf32>
    %296 = arith.subf %292, %295 : vector<1x24xf32>
    %297 = math.exp %296 : vector<1x24xf32>
    %cst_87 = arith.constant dense<0.000000e+00> : vector<1xf32>
    %298 = vector.multi_reduction <add>, %297, %cst_87 [1] : vector<1x24xf32> to vector<1xf32>
    %299 = vector.shape_cast %298 : vector<1xf32> to vector<1x1xf32>
    %300 = math.log %299 : vector<1x1xf32>
    %301 = vector.broadcast %300 : vector<1x1xf32> to vector<1x24xf32>
    %302 = arith.subf %296, %301 : vector<1x24xf32>
    %303 = tpu.concatenate %302, %262, %290, %9 in 1 : vector<1x24xf32>, vector<1x12xf32>, vector<1x32xf32>, vector<1x60xf32> -> vector<1x128xf32>
    %304 = arith.index_cast %c4_i32 : i32 to index
    %c0_88 = arith.constant 0 : index
    %305 = vector.load %arg11[%304, %c0_88] : memref<5x128xf32, #tpu.memory_space<vmem>>, vector<1x128xf32>
    tpu.vector_store %arg11[%304, %c0_88], %303 {strides = array<i32>} : memref<5x128xf32, #tpu.memory_space<vmem>>, vector<1x128xf32>,
    %c5_i32 = arith.constant 5 : i32
    return
  }
}

</mosaic_0001>

<bundles_post_ra>
// kernel: tpu_custom_call.1
= control target key start
LH: loop header
LB: loop body
LE: loop exit
PB: predicated region body
PF: predicated region fallthrough
CT: control target
= control target key end

     0   :  { %s3121_s23 = smov 32   ;;  %v3122_v3 = vmov 0.0|0.0   ;;  %vm3123_vm0 = vmmov 0   ;;  %v3124_v7 = vmov 0.0   ;;  %s3738_s0 = inlined_call_operand.vmem [shape: f32[5,32], index: 0, kind: input, shape index: {}]   ;;  %s3739_s1 = inlined_call_operand.vmem [shape: f32[1,32], index: 1, kind: input, shape index: {}]   ;;  %s3740_s2 = inlined_call_operand.vmem [shape: f32[12,32], index: 2, kind: input, shape index: {}]   ;;  %s3741_s3 = inlined_call_operand.vmem [shape: f32[64,108], index: 3, kind: input, shape index: {}]   ;;  %s3742_s4 = inlined_call_operand.vmem [shape: f32[64,32], index: 4, kind: input, shape index: {}]   ;;  %s3743_s5 = inlined_call_operand.vmem [shape: f32[32,96], index: 5, kind: input, shape index: {}]   ;;  %s3744_s6 = inlined_call_operand.vmem [shape: f32[32,24], index: 6, kind: input, shape index: {}]   ;;  %s3745_s7 = inlined_call_operand.vmem [shape: f32[1,108], index: 7, kind: input, shape index: {}]   ;;  %s3746_s8 = inlined_call_operand.vmem [shape: f32[1,32], index: 8, kind: input, shape index: {}]   ;;  %s3747_s9 = inlined_call_operand.vmem [shape: f32[1,96], index: 9, kind: input, shape index: {}]   ;;  %s3748_s10 = inlined_call_operand.vmem [shape: f32[1,24], index: 10, kind: input, shape index: {}]   ;;  %s3749_s11 = inlined_call_operand.hbm [shape: f32[5,128], index: 11, kind: output, shape index: {}]  }
   0x1   :  { %v2289_v0 = vld [vmem:[%s3739_s1] ss:$0 sm:$0xff]  ;;  %v40_v2 = vld [vmem:[%s3741_s3 + $0x8] sm:$0xff]  ;;  %2815 = vmatprep.subr.bf16.mxu0 %v3122_v3  ;;  %v41_v5 = vld [vmem:[%s3741_s3 + $0x10] sm:$0xff]  ;;  %2496 = vmatprep.mubr.msk.f32.mxu0 %vm3123_vm0, %v3124_v7 }
   0x2   :  { %v39_v1 = vld [vmem:[%s3741_s3] sm:$0xff]  ;;  %76 = vrot.lane.b32.xlu0 %v2289_v0, %s3121_s23  ;;  %v42_v6 = vld [vmem:[%s3741_s3 + $0x18] sm:$0xff]  ;;  %2827 = vmatprep.subr.bf16.mxu1 %v3122_v3 }
   0x3   :  { %v3204_v4 = vpack.c.bf16 %v40_v2, %v39_v1  ;;  %v3216_v8 = vpack.c.bf16 %v42_v6, %v41_v5  ;;  %2503 = vmatprep.mubr.msk.f32.mxu1 %vm3123_vm0, %v3124_v7 }
   0x5   :  { %2817 = vmatpush3.bf16.msra.mxu0 %v3204_v4 }
   0x6   :  { %16 = vsyncpa [#allocation3], 0  ;;  %2818 = vmatprep.subr.bf16.mxu0 %v3122_v3  ;;  %v43_v9 = vld [vmem:[%s3741_s3 + $0x20] sm:$0xff]  ;;  %v44_v10 = vld [vmem:[%s3741_s3 + $0x28] sm:$0xff]  ;;  %vm79_vm1 = vcmask 261120   ;;  %vm81_vm2 = vcmask 523264  }
   0x7   :  { %v3228_v11 = vpack.c.bf16 %v44_v10, %v43_v9  ;;  %v45_v12 = vld [vmem:[%s3741_s3 + $0x30] sm:$0xff]  ;;  %v46_v13 = vld [vmem:[%s3741_s3 + $0x38] sm:$0xff]  ;;  %v3246_v15 = vld [vmem:[%s3738_s0] sm:$0x1]  ;;  %vm155_vm3 = vcmask 90112   ;;  %vm171_vm4 = vcmask 1043456  }
   0x8   :  { %v3238_v14 = vpack.c.bf16 %v46_v13, %v45_v12  ;;  %v3259_v18 = vld [vmem:[%s3745_s7] sm:$0x1]  ;;  %v68_v29 = vld [vmem:[%s3740_s2 + $0x8] sm:$0xf]  ;;  %vm3125_vm5 = vmmov 1   ;;  %vm167_vm7 = vcmask 97280  }
   0x9   :  { %2820 = vmatpush3.bf16.msra.mxu0 %v3216_v8  ;;  %v67_v28 = vld [vmem:[%s3740_s2] sm:$0xff]  ;;  %vm3272_vm6 = vmpackc.low %vm171_vm4, %vm3125_vm5  ;;  %v48_v36 = vld [vmem:[%s3742_s4 + $0x8] sm:$0xff]  ;;  %s3127_s7 = smov 52   ;;  %s3128_s26 = smov 64   ;;  %vm501_vm8 = vcmask 188416   ;;  %vm520_vm9 = vcmask 195584  }
   0xa   :  { %2821 = vmatprep.subr.bf16.mxu0 %v3122_v3  ;;  %v3270_v30 = vpack.c.bf16 %v68_v29, %v67_v28  ;;  %v47_v35 = vld [vmem:[%s3742_s4] sm:$0xff]  ;;  %v49_v37 = vld [vmem:[%s3742_s4 + $0x10] sm:$0xff]  ;;  %v50_v39 = vld [vmem:[%s3742_s4 + $0x18] sm:$0xff]  ;;  %vm522_vm10 = vcmask 293888   ;;  %vm524_vm11 = vcmask 556032  }
   0xb   :  { %v3295_v38 = vpack.c.bf16 %v48_v36, %v47_v35  ;;  %v3301_v40 = vpack.c.bf16 %v50_v39, %v49_v37  ;;  %v51_v41 = vld [vmem:[%s3742_s4 + $0x20] sm:$0xff]  ;;  %v52_v42 = vld [vmem:[%s3742_s4 + $0x28] sm:$0xff]  ;;  %v53_v44 = vld [vmem:[%s3742_s4 + $0x30] sm:$0xff] }
   0xc   :  { %2830 = vmatpush3.bf16.msk.msra.mxu1 %vm3272_vm6, %v3270_v30  ;;  %v3311_v43 = vpack.c.bf16 %v52_v42, %v51_v41  ;;  %v54_v45 = vld [vmem:[%s3742_s4 + $0x38] sm:$0xff]  ;;  %v55_v47 = vld [vmem:[%s3743_s5] sm:$0xff]  ;;  %v56_v48 = vld [vmem:[%s3743_s5 + $0x8] sm:$0xff]  ;;  %s3126_s4 = smov 116  }
   0xd   :  { %2823 = vmatpush3.bf16.msra.mxu0 %v3228_v11  ;;  %2831 = vmatprep.subr.bf16.mxu1 %v3122_v3  ;;  %v3321_v46 = vpack.c.bf16 %v54_v45, %v53_v44  ;;  %v3332_v49 = vpack.c.bf16 %v56_v48, %v55_v47  ;;  %v57_v54 = vld [vmem:[%s3743_s5 + $0x10] sm:$0xff]  ;;  %v58_v55 = vld [vmem:[%s3743_s5 + $0x18] sm:$0xff]  ;;  %v3357_v57 = vld [vmem:[%s3746_s8] sm:$0x1] }
   0xe   :  { %2824 = vmatprep.subr.bf16.mxu0 %v3122_v3  ;;  %v3350_v56 = vpack.c.bf16 %v58_v55, %v57_v54  ;;  %v3374_v62 = vld [vmem:[%s3747_s9] sm:$0x1]  ;;  %s3129_s9 = smov 96   ;;  %v60_v28 = vld [vmem:[%s3744_s6 + $0x8] sm:$0xff]  ;;  %v61_v37 = vld [vmem:[%s3744_s6 + $0x10] sm:$0xff] }
   0xf   :  { %v62_v39 = vld [vmem:[%s3744_s6 + $0x18] sm:$0xff] }
  0x10   :  { %v3412_v41 = vpack.c.bf16 %v62_v39, %v61_v37 }
  0x11   :  { %2826 = vmatpush3.bf16.msra.mxu0 %v3238_v14 }
  0x12   :  { %2843 = vmatprep.subr.bf16.mxu0 %v3122_v3 }
  0x74   :  { %v3248_v16 = vpop.permute.xlu0 %76 }
  0x75   :  { %v80_v17 = vsel %vm79_vm1, %v3246_v15, %v3248_v16 }
  0x76   :  { %2497 = vmatmul.mubr.msk.f32.vlgmr.msra.gmra.mrb[0].mxu0 %vm81_vm2, %v80_v17 }
  0x77   :  { %2533 = vmatprep.mubr.msk.f32.mxu0 %vm3123_vm0, %v3124_v7  ;;  %2845 = vmatpush3.bf16.msra.mxu0 %v3332_v49 }
  0x78   :  { %2846 = vmatprep.subr.bf16.mxu0 %v3122_v3 }
  0x7b   :  { %2848 = vmatpush3.bf16.msra.mxu0 %v3350_v56 }
  0x7c   :  { %2855 = vmatprep.subr.bf16.mxu0 %v3122_v3 }
 0x149   :  { %v151_v19 = vpop.f32.mrb[0].mxu0 }
 0x14a   :  { %v152_v20 = vadd.f32 %v151_v19, %v3259_v18  ;;  %v2498_v21 = vpop.f32.mrb[1].mxu0 }
 0x14c   :  { %v156_v22 = vsel %vm155_vm3, %v152_v20, -inf }
 0x14d   :  { %157 = vmax.xlane.f32.xlu0 %v156_v22 }
 0x1da   :  { %v158_v23 = vpop.xlane.xlu0 %157 }
 0x1db   :  { %v159_v24 = vsub.f32 %v152_v20, %v158_v23 }
 0x1dd   :  { %v160_v25 = vmul.f32 1.442695, %v159_v24 }
 0x1df   :  { %3027 = vpow2.f32 %v160_v25  ;;  %v527_v25 = vld [vmem:[%s3738_s0 + $0x1] sm:$0x1] }
 0x1e9   :  { %v3028_v26 = vpop.eup %3027 }
 0x1ea   :  { %v162_v27 = vsel %vm155_vm3, %v3028_v26, 0.0 }
 0x1eb   :  { %163 = vadd.xlane.f32.xlu1 %v162_v27 }
 0x278   :  { %v164_v32 = vpop.xlane.xlu1 %163 }
 0x279   :  { %3029 = vrcp.f32 %v164_v32 }
 0x283   :  { %v3030_v33 = vpop.eup %3029 }
 0x284   :  { %v3280_v34 = vmul.f32 %v3030_v33, %v3028_v26 }
 0x286   :  { %2504 = vmatmul.mubr.msk.f32.vlgmr.msra.gmra.mrb[0].mxu1 %vm167_vm7, %v3280_v34 }
 0x287   :  { %2522 = vmatprep.mubr.msk.f32.mxu1 %vm3123_vm0, %v3124_v7  ;;  %2833 = vmatpush3.bf16.msra.mxu1 %v3295_v38 }
 0x288   :  { %2834 = vmatprep.subr.bf16.mxu1 %v3122_v3 }
 0x28b   :  { %2836 = vmatpush3.bf16.msra.mxu1 %v3301_v40 }
 0x28c   :  { %2837 = vmatprep.subr.bf16.mxu1 %v3122_v3 }
 0x28f   :  { %2839 = vmatpush3.bf16.msra.mxu1 %v3311_v43 }
 0x290   :  { %2840 = vmatprep.subr.bf16.mxu1 %v3122_v3 }
 0x293   :  { %2842 = vmatpush3.bf16.msra.mxu1 %v3321_v46 }
 0x294   :  { %2849 = vmatprep.subr.bf16.mxu1 %v3122_v3 }
 0x359   :  { %v241_v50 = vpop.f32.mrb[0].mxu1 }
 0x35a   :  { %246 = vrot.lane.b32.xlu1 %v241_v50, %s3121_s23  ;;  %v2505_v51 = vpop.f32.mrb[1].mxu1 }
 0x35e   :  { %398 = vrot.lane.b32.xlu1 %v152_v20, %s3126_s4 }
 0x362   :  { %408 = vrot.lane.b32.xlu1 %v152_v20, %s3127_s7 }
 0x3cc   :  { %v247_v52 = vpop.permute.xlu1 %246 }
 0x3cd   :  { %v249_v53 = vsel %vm79_vm1, %v3246_v15, %v247_v52 }
 0x3ce   :  { %2523 = vmatmul.mubr.msk.f32.vlgmr.msra.gmra.mrb[2].mxu1 %vm81_vm2, %v249_v53 }
 0x3cf   :  { %2544 = vmatprep.mubr.msk.f32.mxu1 %vm3123_vm0, %v3124_v7 }
 0x3d0   :  { %v399_v2 = vpop.permute.xlu1 %398 }
 0x3d4   :  { %v409_v13 = vpop.permute.xlu1 %408 }
 0x4a1   :  { %v319_v58 = vpop.f32.mrb[2].mxu1 }
 0x4a2   :  { %v320_v59 = vadd.f32 %v319_v58, %v3357_v57  ;;  %v2524_v60 = vpop.f32.mrb[3].mxu1 }
 0x4a4   :  { %v323_v61 = vmax.f32 %v320_v59, 0.0 }
 0x4a6   :  { %2534 = vmatmul.mubr.msk.f32.vlgmr.msra.gmra.mrb[2].mxu0 %vm79_vm1, %v323_v61 }
 0x4a7   :  { %2857 = vmatpush3.bf16.msra.mxu0 %v3204_v4  ;;  %2563 = vmatprep.mubr.msk.f32.mxu0 %vm3123_vm0, %v3124_v7 }
 0x4a8   :  { %2858 = vmatprep.subr.bf16.mxu0 %v3122_v3 }
 0x4ab   :  { %2860 = vmatpush3.bf16.msra.mxu0 %v3216_v8 }
 0x4ac   :  { %2861 = vmatprep.subr.bf16.mxu0 %v3122_v3 }
 0x4af   :  { %2863 = vmatpush3.bf16.msra.mxu0 %v3228_v11 }
 0x4b0   :  { %2864 = vmatprep.subr.bf16.mxu0 %v3122_v3 }
 0x4b3   :  { %2866 = vmatpush3.bf16.msra.mxu0 %v3238_v14 }
 0x4b4   :  { %2883 = vmatprep.subr.bf16.mxu0 %v3122_v3 }
 0x579   :  { %v393_v63 = vpop.f32.mrb[2].mxu0 }
 0x57a   :  { %v394_v0 = vadd.f32 %v393_v63, %v3374_v62  ;;  %v2535_v1 = vpop.f32.mrb[3].mxu0 }
 0x57c   :  { %v401_v5 = vadd.f32 %v399_v2, %v394_v0 }
 0x57e   :  { %v2295_v6 = vmul.f32 -1.442695, %v401_v5 }
 0x580   :  { %3031 = vpow2.f32 %v2295_v6 }
 0x58a   :  { %v3032_v9 = vpop.eup %3031 }
 0x58b   :  { %v405_v10 = vadd.f32 1.0, %v3032_v9 }
 0x58d   :  { %3033 = vrcp.f32 %v405_v10 }
 0x597   :  { %v3034_v12 = vpop.eup %3033 }
 0x598   :  { %v411_v15 = vmul.f32 %v3034_v12, %v409_v13  ;;  %v418_v21 = vsub.f32 1.0, %v3034_v12  ;;  %v424_v23 = vmul.f32 %v3034_v12, %v3248_v16  ;;  %v59_v16 = vld [vmem:[%s3744_s6] sm:$0xff] }
 0x599   :  { %v3400_v29 = vpack.c.bf16 %v60_v28, %v59_v16 }
 0x59a   :  { %413 = vrot.lane.b32.xlu1 %v411_v15, %s3128_s26 }
 0x59b   :  { %2851 = vmatpush3.bf16.msra.mxu1 %v3400_v29 }
 0x59c   :  { %2852 = vmatprep.subr.bf16.mxu1 %v3122_v3 }
 0x59f   :  { %2854 = vmatpush3.bf16.msra.mxu1 %v3412_v41 }
 0x5a0   :  { %2867 = vmatprep.subr.bf16.mxu1 %v3122_v3 }
 0x60c   :  { %v414_v17 = vpop.permute.xlu1 %413 }
 0x60d   :  { %v416_v19 = vadd.f32 %v414_v17, %v394_v0 }
 0x60f   :  { %3035 = vtanh.f32 %v416_v19 }
 0x619   :  { %v3036_v20 = vpop.eup %3035 }
 0x61a   :  { %420 = vrot.lane.b32.xlu1 %v3036_v20, %s3129_s9 }
 0x68c   :  { %v421_v22 = vpop.permute.xlu1 %420 }
 0x68d   :  { %v423_v24 = vmul.f32 %v421_v22, %v418_v21 }
 0x68f   :  { %v3383_v26 = vadd.f32 %v424_v23, %v423_v24 }
 0x691   :  { %v528_v27 = vsel %vm79_vm1, %v527_v25, %v3383_v26 }
 0x692   :  { %2564 = vmatmul.mubr.msk.f32.vlgmr.msra.gmra.mrb[4].mxu0 %vm81_vm2, %v528_v27 }
 0x693   :  { %2885 = vmatpush3.bf16.msra.mxu0 %v3332_v49  ;;  %2600 = vmatprep.mubr.msk.f32.mxu0 %vm3123_vm0, %v3124_v7 }
 0x694   :  { %2886 = vmatprep.subr.bf16.mxu0 %v3122_v3 }
 0x697   :  { %2888 = vmatpush3.bf16.msra.mxu0 %v3350_v56 }
 0x698   :  { %2889 = vmatprep.subr.bf16.mxu0 %v3122_v3 }
 0x765   :  { %v598_v32 = vpop.f32.mrb[4].mxu0 }
 0x766   :  { %v599_v33 = vadd.f32 %v598_v32, %v3259_v18  ;;  %v2565_v35 = vpop.f32.mrb[5].mxu0  ;;  %v964_v32 = vld [vmem:[%s3738_s0 + $0x2] sm:$0x1] }
 0x768   :  { %v602_v36 = vsel %vm155_vm3, %v599_v33, -inf }
 0x769   :  { %603 = vmax.xlane.f32.xlu0 %v602_v36 }
 0x77f   :  { %427 = vrot.lane.b32.xlu0 %v3383_v26, %s3129_s9 }
 0x7f6   :  { %v604_v42 = vpop.xlane.xlu0 %603 }
 0x7f7   :  { %v605_v44 = vsub.f32 %v599_v33, %v604_v42 }
 0x7f9   :  { %v606_v45 = vmul.f32 1.442695, %v605_v44 }
 0x7fa   :  { %v428_v47 = vpop.permute.xlu0 %427 }
 0x7fb   :  { %3037 = vpow2.f32 %v606_v45  ;;  %2545 = vmatmul.mubr.msk.f32.vlgmr.msra.gmra.mrb[4].mxu1 %vm79_vm1, %v428_v47 }
 0x7fc   :  { %2870 = vmatpush3.bf16.msk.msra.mxu1 %vm3272_vm6, %v3270_v30  ;;  %2570 = vmatprep.mubr.msk.f32.mxu1 %vm3123_vm0, %v3124_v7 }
 0x7fd   :  { %2871 = vmatprep.subr.bf16.mxu1 %v3122_v3 }
 0x805   :  { %v3038_v48 = vpop.eup %3037 }
 0x806   :  { %v608_v50 = vsel %vm155_vm3, %v3038_v48, 0.0 }
 0x807   :  { %609 = vadd.xlane.f32.xlu1 %v608_v50 }
 0x894   :  { %v610_v51 = vpop.xlane.xlu1 %609 }
 0x895   :  { %3039 = vrcp.f32 %v610_v51 }
 0x89f   :  { %v3040_v52 = vpop.eup %3039 }
 0x8a0   :  { %v3426_v53 = vmul.f32 %v3040_v52, %v3038_v48 }
 0x8a2   :  { %2571 = vmatmul.mubr.msk.f32.vlgmr.msra.gmra.mrb[6].mxu1 %vm167_vm7, %v3426_v53 }
 0x8a3   :  { %2873 = vmatpush3.bf16.msra.mxu1 %v3295_v38  ;;  %2589 = vmatprep.mubr.msk.f32.mxu1 %vm3123_vm0, %v3124_v7 }
 0x8a4   :  { %2874 = vmatprep.subr.bf16.mxu1 %v3122_v3 }
 0x8a7   :  { %2876 = vmatpush3.bf16.msra.mxu1 %v3301_v40 }
 0x8a8   :  { %2877 = vmatprep.subr.bf16.mxu1 %v3122_v3 }
 0x8ab   :  { %2879 = vmatpush3.bf16.msra.mxu1 %v3311_v43 }
 0x8ac   :  { %2880 = vmatprep.subr.bf16.mxu1 %v3122_v3 }
 0x8af   :  { %2882 = vmatpush3.bf16.msra.mxu1 %v3321_v46 }
 0x8b0   :  { %2895 = vmatprep.subr.bf16.mxu1 %v3122_v3 }
 0x8ce   :  { %v3440_v54 = vpop.f32.mrb[4].mxu1 }
 0x8cf   :  { %v2546_v55 = vpop.f32.mrb[5].mxu1 }
 0x975   :  { %v682_v58 = vpop.f32.mrb[6].mxu1 }
 0x976   :  { %687 = vrot.lane.b32.xlu0 %v682_v58, %s3121_s23  ;;  %v2572_v59 = vpop.f32.mrb[7].mxu1 }
 0x97a   :  { %839 = vrot.lane.b32.xlu0 %v599_v33, %s3126_s4 }
 0x97e   :  { %849 = vrot.lane.b32.xlu0 %v599_v33, %s3127_s7 }
 0x9e8   :  { %v688_v60 = vpop.permute.xlu0 %687 }
 0x9e9   :  { %v690_v61 = vsel %vm79_vm1, %v527_v25, %v688_v60 }
 0x9ea   :  { %2590 = vmatmul.mubr.msk.f32.vlgmr.msra.gmra.mrb[8].mxu1 %vm81_vm2, %v690_v61 }
 0x9eb   :  { %2897 = vmatpush3.bf16.msra.mxu1 %v3204_v4  ;;  %2630 = vmatprep.mubr.msk.f32.mxu1 %vm3123_vm0, %v3124_v7 }
 0x9ec   :  { %2898 = vmatprep.subr.bf16.mxu1 %v3122_v3  ;;  %v840_v10 = vpop.permute.xlu0 %839 }
 0x9ef   :  { %2900 = vmatpush3.bf16.msra.mxu1 %v3216_v8 }
 0x9f0   :  { %2901 = vmatprep.subr.bf16.mxu1 %v3122_v3  ;;  %v850_v20 = vpop.permute.xlu0 %849 }
 0x9f3   :  { %2903 = vmatpush3.bf16.msra.mxu1 %v3228_v11 }
 0x9f4   :  { %2904 = vmatprep.subr.bf16.mxu1 %v3122_v3 }
 0x9f7   :  { %2906 = vmatpush3.bf16.msra.mxu1 %v3238_v14 }
 0x9f8   :  { %2923 = vmatprep.subr.bf16.mxu1 %v3122_v3 }
 0xabd   :  { %v760_v63 = vpop.f32.mrb[8].mxu1 }
 0xabe   :  { %v761_v0 = vadd.f32 %v760_v63, %v3357_v57  ;;  %v2591_v1 = vpop.f32.mrb[9].mxu1 }
 0xac0   :  { %v764_v2 = vmax.f32 %v761_v0, 0.0 }
 0xac2   :  { %2601 = vmatmul.mubr.msk.f32.vlgmr.msra.gmra.mrb[6].mxu0 %vm79_vm1, %v764_v2 }
 0xac3   :  { %2891 = vmatpush3.bf16.msra.mxu0 %v3400_v29  ;;  %2611 = vmatprep.mubr.msk.f32.mxu0 %vm3123_vm0, %v3124_v7 }
 0xac4   :  { %2892 = vmatprep.subr.bf16.mxu0 %v3122_v3 }
 0xac7   :  { %2894 = vmatpush3.bf16.msra.mxu0 %v3412_v41 }
 0xac8   :  { %2907 = vmatprep.subr.bf16.mxu0 %v3122_v3 }
 0xb95   :  { %v834_v5 = vpop.f32.mrb[6].mxu0 }
 0xb96   :  { %v835_v6 = vadd.f32 %v834_v5, %v3374_v62  ;;  %v2602_v9 = vpop.f32.mrb[7].mxu0 }
 0xb98   :  { %v842_v12 = vadd.f32 %v840_v10, %v835_v6 }
 0xb9a   :  { %v2302_v13 = vmul.f32 -1.442695, %v842_v12 }
 0xb9c   :  { %3041 = vpow2.f32 %v2302_v13 }
 0xba6   :  { %v3042_v15 = vpop.eup %3041 }
 0xba7   :  { %v846_v17 = vadd.f32 1.0, %v3042_v15 }
 0xba9   :  { %3043 = vrcp.f32 %v846_v17 }
 0xbb3   :  { %v3044_v19 = vpop.eup %3043 }
 0xbb4   :  { %v852_v21 = vmul.f32 %v3044_v19, %v850_v20  ;;  %v859_v25 = vsub.f32 1.0, %v3044_v19  ;;  %v865_v16 = vmul.f32 %v3044_v19, %v3383_v26 }
 0xbb6   :  { %854 = vrot.lane.b32.xlu0 %v852_v21, %s3128_s26 }
 0xc28   :  { %v855_v22 = vpop.permute.xlu0 %854 }
 0xc29   :  { %v857_v23 = vadd.f32 %v855_v22, %v835_v6 }
 0xc2b   :  { %3045 = vtanh.f32 %v857_v23 }
 0xc35   :  { %v3046_v24 = vpop.eup %3045 }
 0xc36   :  { %861 = vrot.lane.b32.xlu1 %v3046_v24, %s3129_s9 }
 0xca8   :  { %v862_v27 = vpop.permute.xlu1 %861 }
 0xca9   :  { %v864_v28 = vmul.f32 %v862_v27, %v859_v25 }
 0xcab   :  { %v3472_v33 = vadd.f32 %v865_v16, %v864_v28 }
 0xcad   :  { %v965_v35 = vsel %vm79_vm1, %v964_v32, %v3472_v33 }
 0xcae   :  { %2631 = vmatmul.mubr.msk.f32.vlgmr.msra.gmra.mrb[10].mxu1 %vm81_vm2, %v965_v35 }
 0xcaf   :  { %2925 = vmatpush3.bf16.msra.mxu1 %v3332_v49  ;;  %2667 = vmatprep.mubr.msk.f32.mxu1 %vm3123_vm0, %v3124_v7 }
 0xcb0   :  { %2926 = vmatprep.subr.bf16.mxu1 %v3122_v3 }
 0xcb3   :  { %2928 = vmatpush3.bf16.msra.mxu1 %v3350_v56 }
 0xcb4   :  { %2929 = vmatprep.subr.bf16.mxu1 %v3122_v3 }
 0xd81   :  { %v1035_v36 = vpop.f32.mrb[10].mxu1 }
 0xd82   :  { %v1036_v37 = vadd.f32 %v1035_v36, %v3259_v18  ;;  %v2632_v39 = vpop.f32.mrb[11].mxu1 }
 0xd84   :  { %v1039_v42 = vsel %vm155_vm3, %v1036_v37, -inf }
 0xd85   :  { %1040 = vmax.xlane.f32.xlu0 %v1039_v42 }
 0xd9b   :  { %868 = vrot.lane.b32.xlu0 %v3472_v33, %s3129_s9 }
 0xd9f   :  { %1276 = vrot.lane.b32.xlu0 %v1036_v37, %s3126_s4 }
 0xda3   :  { %1286 = vrot.lane.b32.xlu0 %v1036_v37, %s3127_s7 }
 0xe12   :  { %v1041_v44 = vpop.xlane.xlu0 %1040 }
 0xe13   :  { %v1042_v45 = vsub.f32 %v1036_v37, %v1041_v44  ;;  %v1401_v37 = vld [vmem:[%s3738_s0 + $0x3] sm:$0x1] }
 0xe15   :  { %v1043_v47 = vmul.f32 1.442695, %v1042_v45 }
 0xe16   :  { %v869_v48 = vpop.permute.xlu0 %868 }
 0xe17   :  { %3047 = vpow2.f32 %v1043_v47  ;;  %2612 = vmatmul.mubr.msk.f32.vlgmr.msra.gmra.mrb[8].mxu0 %vm79_vm1, %v869_v48 }
 0xe18   :  { %2910 = vmatpush3.bf16.msk.msra.mxu0 %vm3272_vm6, %v3270_v30  ;;  %2637 = vmatprep.mubr.msk.f32.mxu0 %vm3123_vm0, %v3124_v7 }
 0xe19   :  { %2911 = vmatprep.subr.bf16.mxu0 %v3122_v3 }
 0xe1a   :  { %v1277_v15 = vpop.permute.xlu0 %1276 }
 0xe1e   :  { %v1287_v23 = vpop.permute.xlu0 %1286 }
 0xe21   :  { %v3048_v50 = vpop.eup %3047 }
 0xe22   :  { %v1045_v51 = vsel %vm155_vm3, %v3048_v50, 0.0 }
 0xe23   :  { %1046 = vadd.xlane.f32.xlu1 %v1045_v51 }
 0xeb0   :  { %v1047_v52 = vpop.xlane.xlu1 %1046 }
 0xeb1   :  { %3049 = vrcp.f32 %v1047_v52 }
 0xebb   :  { %v3050_v55 = vpop.eup %3049 }
 0xebc   :  { %v3497_v58 = vmul.f32 %v3050_v55, %v3048_v50 }
 0xebe   :  { %2638 = vmatmul.mubr.msk.f32.vlgmr.msra.gmra.mrb[10].mxu0 %vm167_vm7, %v3497_v58 }
 0xebf   :  { %2913 = vmatpush3.bf16.msra.mxu0 %v3295_v38  ;;  %2656 = vmatprep.mubr.msk.f32.mxu0 %vm3123_vm0, %v3124_v7 }
 0xec0   :  { %2914 = vmatprep.subr.bf16.mxu0 %v3122_v3 }
 0xec3   :  { %2916 = vmatpush3.bf16.msra.mxu0 %v3301_v40 }
 0xec4   :  { %2917 = vmatprep.subr.bf16.mxu0 %v3122_v3 }
 0xec7   :  { %2919 = vmatpush3.bf16.msra.mxu0 %v3311_v43 }
 0xec8   :  { %2920 = vmatprep.subr.bf16.mxu0 %v3122_v3 }
 0xecb   :  { %2922 = vmatpush3.bf16.msra.mxu0 %v3321_v46 }
 0xecc   :  { %2935 = vmatprep.subr.bf16.mxu0 %v3122_v3 }
 0xeea   :  { %v3511_v59 = vpop.f32.mrb[8].mxu0 }
 0xeeb   :  { %v2613_v60 = vpop.f32.mrb[9].mxu0 }
 0xf91   :  { %v1119_v61 = vpop.f32.mrb[10].mxu0 }
 0xf92   :  { %1124 = vrot.lane.b32.xlu1 %v1119_v61, %s3121_s23  ;;  %v2639_v63 = vpop.f32.mrb[11].mxu0 }
0x1004   :  { %v1125_v0 = vpop.permute.xlu1 %1124 }
0x1005   :  { %v1127_v1 = vsel %vm79_vm1, %v964_v32, %v1125_v0 }
0x1006   :  { %2657 = vmatmul.mubr.msk.f32.vlgmr.msra.gmra.mrb[12].mxu0 %vm81_vm2, %v1127_v1 }
0x1007   :  { %2937 = vmatpush3.bf16.msra.mxu0 %v3204_v4  ;;  %2697 = vmatprep.mubr.msk.f32.mxu0 %vm3123_vm0, %v3124_v7 }
0x1008   :  { %2938 = vmatprep.subr.bf16.mxu0 %v3122_v3 }
0x100b   :  { %2940 = vmatpush3.bf16.msra.mxu0 %v3216_v8 }
0x100c   :  { %2941 = vmatprep.subr.bf16.mxu0 %v3122_v3 }
0x100f   :  { %2943 = vmatpush3.bf16.msra.mxu0 %v3228_v11 }
0x1010   :  { %2944 = vmatprep.subr.bf16.mxu0 %v3122_v3 }
0x1013   :  { %2946 = vmatpush3.bf16.msra.mxu0 %v3238_v14 }
0x1014   :  { %2963 = vmatprep.subr.bf16.mxu0 %v3122_v3 }
0x10d9   :  { %v1197_v2 = vpop.f32.mrb[12].mxu0 }
0x10da   :  { %v1198_v5 = vadd.f32 %v1197_v2, %v3357_v57  ;;  %v2658_v6 = vpop.f32.mrb[13].mxu0 }
0x10dc   :  { %v1201_v9 = vmax.f32 %v1198_v5, 0.0 }
0x10de   :  { %2668 = vmatmul.mubr.msk.f32.vlgmr.msra.gmra.mrb[12].mxu1 %vm79_vm1, %v1201_v9 }
0x10df   :  { %2931 = vmatpush3.bf16.msra.mxu1 %v3400_v29  ;;  %2678 = vmatprep.mubr.msk.f32.mxu1 %vm3123_vm0, %v3124_v7 }
0x10e0   :  { %2932 = vmatprep.subr.bf16.mxu1 %v3122_v3 }
0x10e3   :  { %2934 = vmatpush3.bf16.msra.mxu1 %v3412_v41 }
0x10e4   :  { %2947 = vmatprep.subr.bf16.mxu1 %v3122_v3 }
0x11b1   :  { %v1271_v10 = vpop.f32.mrb[12].mxu1 }
0x11b2   :  { %v1272_v12 = vadd.f32 %v1271_v10, %v3374_v62  ;;  %v2669_v13 = vpop.f32.mrb[13].mxu1 }
0x11b4   :  { %v1279_v17 = vadd.f32 %v1277_v15, %v1272_v12 }
0x11b6   :  { %v2309_v19 = vmul.f32 -1.442695, %v1279_v17 }
0x11b8   :  { %3051 = vpow2.f32 %v2309_v19 }
0x11c2   :  { %v3052_v20 = vpop.eup %3051 }
0x11c3   :  { %v1283_v21 = vadd.f32 1.0, %v3052_v20 }
0x11c5   :  { %3053 = vrcp.f32 %v1283_v21 }
0x11cf   :  { %v3054_v22 = vpop.eup %3053 }
0x11d0   :  { %v1289_v24 = vmul.f32 %v3054_v22, %v1287_v23  ;;  %v1296_v28 = vsub.f32 1.0, %v3054_v22  ;;  %v1302_v35 = vmul.f32 %v3054_v22, %v3472_v33 }
0x11d2   :  { %1291 = vrot.lane.b32.xlu0 %v1289_v24, %s3128_s26 }
0x1244   :  { %v1292_v25 = vpop.permute.xlu0 %1291 }
0x1245   :  { %v1294_v27 = vadd.f32 %v1292_v25, %v1272_v12 }
0x1247   :  { %3055 = vtanh.f32 %v1294_v27 }
0x1251   :  { %v3056_v16 = vpop.eup %3055 }
0x1252   :  { %1298 = vrot.lane.b32.xlu0 %v3056_v16, %s3129_s9 }
0x12c4   :  { %v1299_v32 = vpop.permute.xlu0 %1298 }
0x12c5   :  { %v1301_v36 = vmul.f32 %v1299_v32, %v1296_v28 }
0x12c7   :  { %v3541_v39 = vadd.f32 %v1302_v35, %v1301_v36 }
0x12c9   :  { %v1402_v42 = vsel %vm79_vm1, %v1401_v37, %v3541_v39 }
0x12ca   :  { %2698 = vmatmul.mubr.msk.f32.vlgmr.msra.gmra.mrb[14].mxu0 %vm81_vm2, %v1402_v42 }
0x12cb   :  { %2965 = vmatpush3.bf16.msra.mxu0 %v3332_v49  ;;  %2734 = vmatprep.mubr.msk.f32.mxu0 %vm3123_vm0, %v3124_v7 }
0x12cc   :  { %2966 = vmatprep.subr.bf16.mxu0 %v3122_v3 }
0x12cf   :  { %2968 = vmatpush3.bf16.msra.mxu0 %v3350_v56 }
0x12d0   :  { %2969 = vmatprep.subr.bf16.mxu0 %v3122_v3 }
0x139d   :  { %v1472_v44 = vpop.f32.mrb[14].mxu0 }
0x139e   :  { %v1473_v45 = vadd.f32 %v1472_v44, %v3259_v18  ;;  %v2699_v47 = vpop.f32.mrb[15].mxu0  ;;  %v1838_v44 = vld [vmem:[%s3738_s0 + $0x4] sm:$0x1] }
0x13a0   :  { %v1476_v48 = vsel %vm155_vm3, %v1473_v45, -inf }
0x13a1   :  { %1477 = vmax.xlane.f32.xlu1 %v1476_v48 }
0x142e   :  { %v1478_v50 = vpop.xlane.xlu1 %1477 }
0x142f   :  { %v1479_v51 = vsub.f32 %v1473_v45, %v1478_v50 }
0x1431   :  { %v1480_v52 = vmul.f32 1.442695, %v1479_v51 }
0x1433   :  { %3057 = vpow2.f32 %v1480_v52 }
0x143d   :  { %v3058_v55 = vpop.eup %3057 }
0x143e   :  { %v1482_v60 = vsel %vm155_vm3, %v3058_v55, 0.0 }
0x143f   :  { %1483 = vadd.xlane.f32.xlu0 %v1482_v60 }
0x1455   :  { %1305 = vrot.lane.b32.xlu0 %v3541_v39, %s3129_s9 }
0x1459   :  { %1723 = vrot.lane.b32.xlu0 %v1473_v45, %s3127_s7 }
0x14cc   :  { %v1484_v61 = vpop.xlane.xlu0 %1483 }
0x14cd   :  { %3059 = vrcp.f32 %v1484_v61 }
0x14d0   :  { %v1306_v63 = vpop.permute.xlu0 %1305 }
0x14d1   :  { %2679 = vmatmul.mubr.msk.f32.vlgmr.msra.gmra.mrb[14].mxu1 %vm79_vm1, %v1306_v63 }
0x14d2   :  { %2950 = vmatpush3.bf16.msk.msra.mxu1 %vm3272_vm6, %v3270_v30  ;;  %2704 = vmatprep.mubr.msk.f32.mxu1 %vm3123_vm0, %v3124_v7 }
0x14d3   :  { %2951 = vmatprep.subr.bf16.mxu1 %v3122_v3 }
0x14d4   :  { %v1724_v25 = vpop.permute.xlu0 %1723 }
0x14d7   :  { %v3060_v0 = vpop.eup %3059 }
0x14d8   :  { %v3565_v1 = vmul.f32 %v3060_v0, %v3058_v55 }
0x14da   :  { %2705 = vmatmul.mubr.msk.f32.vlgmr.msra.gmra.mrb[16].mxu1 %vm167_vm7, %v3565_v1 }
0x14db   :  { %2953 = vmatpush3.bf16.msra.mxu1 %v3295_v38  ;;  %2723 = vmatprep.mubr.msk.f32.mxu1 %vm3123_vm0, %v3124_v7 }
0x14dc   :  { %2954 = vmatprep.subr.bf16.mxu1 %v3122_v3 }
0x14df   :  { %2956 = vmatpush3.bf16.msra.mxu1 %v3301_v40 }
0x14e0   :  { %2957 = vmatprep.subr.bf16.mxu1 %v3122_v3 }
0x14e3   :  { %2959 = vmatpush3.bf16.msra.mxu1 %v3311_v43 }
0x14e4   :  { %2960 = vmatprep.subr.bf16.mxu1 %v3122_v3 }
0x14e7   :  { %2962 = vmatpush3.bf16.msra.mxu1 %v3321_v46 }
0x14e8   :  { %2975 = vmatprep.subr.bf16.mxu1 %v3122_v3 }
0x15a4   :  { %v3579_v2 = vpop.f32.mrb[14].mxu1 }
0x15a5   :  { %v2680_v5 = vpop.f32.mrb[15].mxu1 }
0x15ad   :  { %v1556_v6 = vpop.f32.mrb[16].mxu1 }
0x15ae   :  { %1561 = vrot.lane.b32.xlu1 %v1556_v6, %s3121_s23  ;;  %v2706_v9 = vpop.f32.mrb[17].mxu1 }
0x15b2   :  { %1713 = vrot.lane.b32.xlu1 %v1473_v45, %s3126_s4 }
0x1620   :  { %v1562_v10 = vpop.permute.xlu1 %1561 }
0x1621   :  { %v1564_v12 = vsel %vm79_vm1, %v1401_v37, %v1562_v10 }
0x1622   :  { %2724 = vmatmul.mubr.msk.f32.vlgmr.msra.gmra.mrb[18].mxu1 %vm81_vm2, %v1564_v12 }
0x1623   :  { %2977 = vmatpush3.bf16.msra.mxu1 %v3204_v4  ;;  %2764 = vmatprep.mubr.msk.f32.mxu1 %vm3123_vm0, %v3124_v7 }
0x1624   :  { %2978 = vmatprep.subr.bf16.mxu1 %v3122_v3  ;;  %v1714_v19 = vpop.permute.xlu1 %1713 }
0x1627   :  { %2980 = vmatpush3.bf16.msra.mxu1 %v3216_v8 }
0x1628   :  { %2981 = vmatprep.subr.bf16.mxu1 %v3122_v3 }
0x162b   :  { %2983 = vmatpush3.bf16.msra.mxu1 %v3228_v11 }
0x162c   :  { %2984 = vmatprep.subr.bf16.mxu1 %v3122_v3 }
0x162f   :  { %2986 = vmatpush3.bf16.msra.mxu1 %v3238_v14 }
0x1630   :  { %3003 = vmatprep.subr.bf16.mxu1 %v3122_v3 }
0x16f5   :  { %v1634_v13 = vpop.f32.mrb[18].mxu1 }
0x16f6   :  { %v1635_v4 = vadd.f32 %v1634_v13, %v3357_v57  ;;  %v2725_v15 = vpop.f32.mrb[19].mxu1 }
0x16f8   :  { %v1638_v17 = vmax.f32 %v1635_v4, 0.0 }
0x16fa   :  { %2735 = vmatmul.mubr.msk.f32.vlgmr.msra.gmra.mrb[16].mxu0 %vm79_vm1, %v1638_v17 }
0x16fb   :  { %2971 = vmatpush3.bf16.msra.mxu0 %v3400_v29  ;;  %2745 = vmatprep.mubr.msk.f32.mxu0 %vm3123_vm0, %v3124_v7 }
0x16fc   :  { %2972 = vmatprep.subr.bf16.mxu0 %v3122_v3 }
0x16ff   :  { %2974 = vmatpush3.bf16.msra.mxu0 %v3412_v41 }
0x1700   :  { %2987 = vmatprep.subr.bf16.mxu0 %v3122_v3 }
0x17cd   :  { %v1708_v8 = vpop.f32.mrb[16].mxu0 }
0x17ce   :  { %v1709_v11 = vadd.f32 %v1708_v8, %v3374_v62  ;;  %v2736_v14 = vpop.f32.mrb[17].mxu0 }
0x17d0   :  { %v1716_v20 = vadd.f32 %v1714_v19, %v1709_v11 }
0x17d2   :  { %v2316_v21 = vmul.f32 -1.442695, %v1716_v20 }
0x17d4   :  { %3061 = vpow2.f32 %v2316_v21 }
0x17de   :  { %v3062_v22 = vpop.eup %3061 }
0x17df   :  { %v1720_v23 = vadd.f32 1.0, %v3062_v22 }
0x17e1   :  { %3063 = vrcp.f32 %v1720_v23 }
0x17eb   :  { %v3064_v24 = vpop.eup %3063 }
0x17ec   :  { %v1726_v27 = vmul.f32 %v3064_v24, %v1724_v25  ;;  %v1733_v35 = vsub.f32 1.0, %v3064_v24  ;;  %v1739_v37 = vmul.f32 %v3064_v24, %v3541_v39 }
0x17ee   :  { %1728 = vrot.lane.b32.xlu1 %v1726_v27, %s3128_s26 }
0x1860   :  { %v1729_v16 = vpop.permute.xlu1 %1728 }
0x1861   :  { %v1731_v28 = vadd.f32 %v1729_v16, %v1709_v11 }
0x1863   :  { %3065 = vtanh.f32 %v1731_v28 }
0x186d   :  { %v3066_v32 = vpop.eup %3065 }
0x186e   :  { %1735 = vrot.lane.b32.xlu0 %v3066_v32, %s3129_s9 }
0x18e0   :  { %v1736_v36 = vpop.permute.xlu0 %1735 }
0x18e1   :  { %v1738_v42 = vmul.f32 %v1736_v36, %v1733_v35 }
0x18e3   :  { %v3610_v45 = vadd.f32 %v1739_v37, %v1738_v42 }
0x18e5   :  { %v1839_v47 = vsel %vm79_vm1, %v1838_v44, %v3610_v45 }
0x18e6   :  { %2765 = vmatmul.mubr.msk.f32.vlgmr.msra.gmra.mrb[20].mxu1 %vm81_vm2, %v1839_v47 }
0x18e7   :  { %3005 = vmatpush3.bf16.msra.mxu1 %v3332_v49  ;;  %2801 = vmatprep.mubr.msk.f32.mxu1 %vm3123_vm0, %v3124_v7 }
0x18e8   :  { %3006 = vmatprep.subr.bf16.mxu1 %v3122_v3 }
0x18eb   :  { %3008 = vmatpush3.bf16.msra.mxu1 %v3350_v56 }
0x18ec   :  { %3009 = vmatprep.subr.bf16.mxu1 %v3122_v3 }
0x19b9   :  { %v1909_v48 = vpop.f32.mrb[20].mxu1 }
0x19ba   :  { %v1910_v50 = vadd.f32 %v1909_v48, %v3259_v18  ;;  %v2766_v51 = vpop.f32.mrb[21].mxu1 }
0x19bc   :  { %v1913_v52 = vsel %vm155_vm3, %v1910_v50, -inf }
0x19bd   :  { %1914 = vmax.xlane.f32.xlu1 %v1913_v52 }
0x1a4a   :  { %v1915_v55 = vpop.xlane.xlu1 %1914 }
0x1a4b   :  { %v1916_v60 = vsub.f32 %v1910_v50, %v1915_v55 }
0x1a4d   :  { %v1917_v61 = vmul.f32 1.442695, %v1916_v60 }
0x1a4f   :  { %3067 = vpow2.f32 %v1917_v61 }
0x1a59   :  { %v3068_v49 = vpop.eup %3067 }
0x1a5a   :  { %v1919_v63 = vsel %vm155_vm3, %v3068_v49, 0.0 }
0x1a5b   :  { %1920 = vadd.xlane.f32.xlu0 %v1919_v63 }
0x1a71   :  { %1742 = vrot.lane.b32.xlu0 %v3610_v45, %s3129_s9 }
0x1a75   :  { %2160 = vrot.lane.b32.xlu0 %v1910_v50, %s3127_s7  ;;  %s3132_s7 = smov [#allocation2]  }
0x1a76   :  { %s2281_s2 = sshll.u32 %s3132_s7, 4  ;;  %s2282_s2 = int_to_ptr.vmem [resolvable:$true] %s2281_s2 }
0x1a77   :  { %s3097_s22 = scalar_lea.vmem %s2282_s2, 128  ;;  %p3102_p1 = scmp.lt.s32.totalorder %s2282_s2, %s2282_s2 }
0x1a78   :  { %p3098_p0 = scmp.ne.s32.totalorder %s2282_s2, %s3097_s22  ;;  %p3103_p2 = scmp.lt.s32.totalorder %s3097_s22, %s3097_s22 }
0x1a7a   :  { %p3104_p3 = por %p3103_p2, %p3102_p1 }
0x1a7c   :  { %p3105_p4 = pnand %p3104_p3, %p3098_p0 }
0x1ae8   :  { %v1921_v56 = vpop.xlane.xlu0 %1920 }
0x1ae9   :  { %3069 = vrcp.f32 %v1921_v56 }
0x1aec   :  { %v1743_v18 = vpop.permute.xlu0 %1742 }
0x1aed   :  { %2746 = vmatmul.mubr.msk.f32.vlgmr.msra.gmra.mrb[18].mxu0 %vm79_vm1, %v1743_v18 }
0x1aee   :  { %2990 = vmatpush3.bf16.msk.msra.mxu0 %vm3272_vm6, %v3270_v30  ;;  %2771 = vmatprep.mubr.msk.f32.mxu0 %vm3123_vm0, %v3124_v7 }
0x1aef   :  { %2991 = vmatprep.subr.bf16.mxu0 %v3122_v3 }
0x1af3   :  { %v3070_v0 = vpop.eup %3069 }
0x1af4   :  { %v3634_v5 = vmul.f32 %v3070_v0, %v3068_v49 }
0x1af6   :  { %2772 = vmatmul.mubr.msk.f32.vlgmr.msra.gmra.mrb[20].mxu0 %vm167_vm7, %v3634_v5 }
0x1af7   :  { %2993 = vmatpush3.bf16.msra.mxu0 %v3295_v38  ;;  %2790 = vmatprep.mubr.msk.f32.mxu0 %vm3123_vm0, %v3124_v7 }
0x1af8   :  { %2994 = vmatprep.subr.bf16.mxu0 %v3122_v3 }
0x1afb   :  { %2996 = vmatpush3.bf16.msra.mxu0 %v3301_v40 }
0x1afc   :  { %2997 = vmatprep.subr.bf16.mxu0 %v3122_v3 }
0x1aff   :  { %2999 = vmatpush3.bf16.msra.mxu0 %v3311_v43 }
0x1b00   :  { %3000 = vmatprep.subr.bf16.mxu0 %v3122_v3 }
0x1b03   :  { %3002 = vmatpush3.bf16.msra.mxu0 %v3321_v46 }
0x1bc0   :  { %v1812_v30 = vpop.f32.mrb[18].mxu0 }
0x1bc1   :  { %v2747_v31 = vpop.f32.mrb[19].mxu0 }
0x1bc9   :  { %v1993_v6 = vpop.f32.mrb[20].mxu0 }
0x1bca   :  { %1998 = vrot.lane.b32.xlu1 %v1993_v6, %s3121_s23  ;;  %v2773_v38 = vpop.f32.mrb[21].mxu0 }
0x1bce   :  { %2150 = vrot.lane.b32.xlu1 %v1910_v50, %s3126_s4  ;;  %s3131_s4 = smov 24  }
0x1c3c   :  { %v1999_v9 = vpop.permute.xlu1 %1998 }
0x1c3d   :  { %v2001_v10 = vsel %vm79_vm1, %v1838_v44, %v1999_v9 }
0x1c3e   :  { %2791 = vmatmul.mubr.msk.f32.vlgmr.msra.gmra.mrb[22].mxu0 %vm81_vm2, %v2001_v10 }
0x1c40   :  { %v2151_v17 = vpop.permute.xlu1 %2150 }
0x1d11   :  { %v2071_v40 = vpop.f32.mrb[22].mxu0 }
0x1d12   :  { %v2072_v43 = vadd.f32 %v2071_v40, %v3357_v57  ;;  %v2792_v12 = vpop.f32.mrb[23].mxu0 }
0x1d14   :  { %v2075_v13 = vmax.f32 %v2072_v43, 0.0 }
0x1d16   :  { %2802 = vmatmul.mubr.msk.f32.vlgmr.msra.gmra.mrb[22].mxu1 %vm79_vm1, %v2075_v13 }
0x1d17   :  { %3011 = vmatpush3.bf16.msra.mxu1 %v3400_v29  ;;  %2812 = vmatprep.mubr.msk.f32.mxu1 %vm3123_vm0, %v3124_v7  ;;  %v2161_v29 = vpop.permute.xlu0 %2160 }
0x1d18   :  { %3012 = vmatprep.subr.bf16.mxu1 %v3122_v3 }
0x1d1b   :  { %3014 = vmatpush3.bf16.msra.mxu1 %v3412_v41 }
0x1de9   :  { %v2145_v46 = vpop.f32.mrb[22].mxu1 }
0x1dea   :  { %v2146_v4 = vadd.f32 %v2145_v46, %v3374_v62  ;;  %v2803_v15 = vpop.f32.mrb[23].mxu1  ;;  %v66_v62 = vld [vmem:[%s3748_s10] sm:$0x1]  ;;  %s3130_s10 = smov 4  }
0x1deb   :  { %v498_v21 = vadd.f32 %v3440_v54, %v66_v62  ;;  %v1376_v22 = vadd.f32 %v3579_v2, %v66_v62  ;;  %v1813_v24 = vadd.f32 %v1812_v30, %v66_v62  ;;  %v939_v54 = vadd.f32 %v3511_v59, %v66_v62 }
0x1dec   :  { %v2153_v8 = vadd.f32 %v2151_v17, %v2146_v4 }
0x1ded   :  { %v502_v23 = vsel %vm501_vm8, %v498_v21, -inf  ;;  %v1379_v25 = vsel %vm501_vm8, %v1376_v22, -inf  ;;  %v1816_v27 = vsel %vm501_vm8, %v1813_v24, -inf  ;;  %v942_v2 = vsel %vm501_vm8, %v939_v54, -inf }
0x1dee   :  { %v2323_v57 = vmul.f32 -1.442695, %v2153_v8 }
0x1df0   :  { %3071 = vpow2.f32 %v2323_v57 }
0x1dfa   :  { %v3072_v11 = vpop.eup %3071 }
0x1dfb   :  { %v2157_v14 = vadd.f32 1.0, %v3072_v11 }
0x1dfd   :  { %3073 = vrcp.f32 %v2157_v14 }
0x1e07   :  { %v3074_v19 = vpop.eup %3073 }
0x1e08   :  { %v2163_v20 = vmul.f32 %v3074_v19, %v2161_v29  ;;  %v2170_v16 = vsub.f32 1.0, %v3074_v19  ;;  %v2176_v32 = vmul.f32 %v3074_v19, %v3610_v45 }
0x1e0a   :  { %2165 = vrot.lane.b32.xlu1 %v2163_v20, %s3128_s26 }
0x1e7c   :  { %v2166_v7 = vpop.permute.xlu1 %2165 }
0x1e7d   :  { %v2168_v3 = vadd.f32 %v2166_v7, %v2146_v4 }
0x1e7f   :  { %3075 = vtanh.f32 %v2168_v3 }
0x1e89   :  { %v3076_v41 = vpop.eup %3075 }
0x1e8a   :  { %2172 = vrot.lane.b32.xlu0 %v3076_v41, %s3129_s9 }
0x1ea9   :  { %503 = vmax.xlane.f32.xlu0 %v502_v23 }
0x1ead   :  { %1380 = vmax.xlane.f32.xlu0 %v1379_v25 }
0x1eb1   :  { %1817 = vmax.xlane.f32.xlu0 %v1816_v27 }
0x1efc   :  { %v2173_v28 = vpop.permute.xlu0 %2172 }
0x1efd   :  { %v2175_v35 = vmul.f32 %v2173_v28, %v2170_v16 }
0x1eff   :  { %v3670_v36 = vadd.f32 %v2176_v32, %v2175_v35 }
0x1f01   :  { %2179 = vrot.lane.b32.xlu1 %v3670_v36, %s3129_s9 }
0x1f25   :  { %943 = vmax.xlane.f32.xlu1 %v942_v2 }
0x1f36   :  { %v504_v37 = vpop.xlane.xlu0 %503 }
0x1f37   :  { %v505_v42 = vsub.f32 %v498_v21, %v504_v37 }
0x1f39   :  { %v506_v44 = vmul.f32 1.442695, %v505_v42 }
0x1f3a   :  { %v1381_v59 = vpop.xlane.xlu0 %1380 }
0x1f3b   :  { %3077 = vpow2.f32 %v506_v44  ;;  %v3681_v50 = vsub.f32 %v1376_v22, %v1381_v59 }
0x1f3d   :  { %v1383_v51 = vmul.f32 1.442695, %v3681_v50 }
0x1f3e   :  { %v1818_v18 = vpop.xlane.xlu0 %1817 }
0x1f3f   :  { %3079 = vpow2.f32 %v1383_v51  ;;  %v3695_v0 = vsub.f32 %v1813_v24, %v1818_v18 }
0x1f45   :  { %v3078_v47 = vpop.eup %3077 }
0x1f46   :  { %v508_v48 = vsel %vm501_vm8, %v3078_v47, 0.0 }
0x1f47   :  { %509 = vadd.xlane.f32.xlu0 %v508_v48 }
0x1f49   :  { %v3080_v55 = vpop.eup %3079 }
0x1f4a   :  { %v1385_v60 = vsel %vm501_vm8, %v3080_v55, 0.0 }
0x1f5d   :  { %517 = vrot.lane.b32.xlu0 %v3383_v26, %s3130_s10 }
0x1f61   :  { %954 = vrot.lane.b32.xlu0 %v3426_v53, %s3131_s4 }
0x1f73   :  { %v2180_v52 = vpop.permute.xlu1 %2179 }
0x1f74   :  { %2813 = vmatmul.mubr.msk.f32.vlgmr.msra.gmra.mrb[24].mxu1 %vm79_vm1, %v2180_v52 }
0x1f80   :  { %1386 = vadd.xlane.f32.xlu0 %v1385_v60 }
0x1f96   :  { %957 = vrot.lane.b32.xlu0 %v3472_v33, %s3130_s10 }
0x1f9a   :  { %2265 = vrot.lane.b32.xlu0 %v3634_v5, %s3131_s4  ;;  %v1820_v5 = vmul.f32 1.442695, %v3695_v0 }
0x1f9e   :  { %1831 = vrot.lane.b32.xlu0 %v3610_v45, %s3130_s10 }
0x1fb2   :  { %v944_v63 = vpop.xlane.xlu1 %943 }
0x1fb3   :  { %v945_v56 = vsub.f32 %v939_v54, %v944_v63 }
0x1fb5   :  { %v946_v33 = vmul.f32 1.442695, %v945_v56 }
0x1fb7   :  { %3081 = vpow2.f32 %v946_v33 }
0x1fb8   :  { %3083 = vpow2.f32 %v1820_v5 }
0x1fc1   :  { %v3082_v45 = vpop.eup %3081 }
0x1fc2   :  { %v948_v30 = vsel %vm501_vm8, %v3082_v45, 0.0  ;;  %v3084_v31 = vpop.eup %3083 }
0x1fc3   :  { %v1822_v6 = vsel %vm501_vm8, %v3084_v31, 0.0 }
0x2047   :  { %v2249_v26 = vpop.f32.mrb[24].mxu1 }
0x2048   :  { %v2250_v53 = vadd.f32 %v2249_v26, %v66_v62  ;;  %v2814_v61 = vpop.f32.mrb[25].mxu1 }
0x204a   :  { %v2253_v49 = vsel %vm501_vm8, %v2250_v53, -inf }
0x204b   :  { %2254 = vmax.xlane.f32.xlu1 %v2253_v49 }
0x205c   :  { %514 = vrot.lane.b32.xlu1 %v3280_v34, %s3131_s4  ;;  %v510_v34 = vpop.xlane.xlu0 %509 }
0x205d   :  { %3085 = vlog2.f32 %v510_v34 }
0x2060   :  { %v518_v46 = vpop.permute.xlu0 %517 }
0x2064   :  { %v955_v17 = vpop.permute.xlu0 %954 }
0x2067   :  { %v3086_v38 = vpop.eup %3085 }
0x2068   :  { %v512_v9 = vmul.f32 0.6931472, %v3086_v38  ;;  %v1387_v8 = vpop.xlane.xlu0 %1386 }
0x206a   :  { %v513_v43 = vsub.f32 %v505_v42, %v512_v9 }
0x206c   :  { %v958_v19 = vpop.permute.xlu0 %957 }
0x2070   :  { %v2266_v21 = vpop.permute.xlu0 %2265 }
0x2074   :  { %v1832_v2 = vpop.permute.xlu0 %1831 }
0x2080   :  { %949 = vadd.xlane.f32.xlu1 %v948_v30 }
0x2084   :  { %1823 = vadd.xlane.f32.xlu1 %v1822_v6 }
0x2095   :  { %1391 = vrot.lane.b32.xlu1 %v3497_v58, %s3131_s4 }
0x2099   :  { %1828 = vrot.lane.b32.xlu1 %v3565_v1, %s3131_s4 }
0x209d   :  { %1394 = vrot.lane.b32.xlu1 %v3541_v39, %s3130_s10 }
0x20d8   :  { %v2255_v10 = vpop.xlane.xlu1 %2254 }
0x20d9   :  { %v2256_v40 = vsub.f32 %v2250_v53, %v2255_v10 }
0x20db   :  { %v2257_v12 = vmul.f32 1.442695, %v2256_v40 }
0x20dc   :  { %v515_v13 = vpop.permute.xlu1 %514 }
0x20dd   :  { %3087 = vpow2.f32 %v2257_v12  ;;  %v521_v58 = vsel %vm520_vm9, %v513_v43, %v515_v13 }
0x20de   :  { %v523_v1 = vsel %vm522_vm10, %v521_v58, %v518_v46  ;;  %3089 = vlog2.f32 %v1387_v8 }
0x20df   :  { %v525_v39 = vsel %vm524_vm11, %v523_v1, 0.0 }
0x20e0   :  { %526 = vst [vmem:[#allocation2] sm:$0x1] %v525_v39 }
0x20e7   :  { %v3088_v4 = vpop.eup %3087 }
0x20e8   :  { %v2259_v15 = vsel %vm501_vm8, %v3088_v4, 0.0  ;;  %v3090_v14 = vpop.eup %3089 }
0x20e9   :  { %2260 = vadd.xlane.f32.xlu1 %v2259_v15  ;;  %v1389_v20 = vmul.f32 0.6931472, %v3090_v14 }
0x20eb   :  { %v1390_v62 = vsub.f32 %v3681_v50, %v1389_v20 }
0x20fa   :  { %2268 = vrot.lane.b32.xlu1 %v3670_v36, %s3130_s10 }
0x210d   :  { %v950_v57 = vpop.xlane.xlu1 %949 }
0x210e   :  { %3091 = vlog2.f32 %v950_v57 }
0x2111   :  { %v1824_v11 = vpop.xlane.xlu1 %1823 }
0x2112   :  { %3093 = vlog2.f32 %v1824_v11 }
0x2115   :  { %v1392_v29 = vpop.permute.xlu1 %1391 }
0x2116   :  { %v1397_v27 = vsel %vm520_vm9, %v1390_v62, %v1392_v29 }
0x2118   :  { %v3092_v7 = vpop.eup %3091 }
0x2119   :  { %v952_v3 = vmul.f32 0.6931472, %v3092_v7  ;;  %v1829_v41 = vpop.permute.xlu1 %1828 }
0x211b   :  { %v953_v22 = vsub.f32 %v945_v56, %v952_v3 }
0x211c   :  { %v3094_v23 = vpop.eup %3093 }
0x211d   :  { %v960_v24 = vsel %vm520_vm9, %v953_v22, %v955_v17  ;;  %v1826_v25 = vmul.f32 0.6931472, %v3094_v23  ;;  %v1395_v16 = vpop.permute.xlu1 %1394 }
0x211e   :  { %v961_v28 = vsel %vm522_vm10, %v960_v24, %v958_v19  ;;  %v1398_v32 = vsel %vm522_vm10, %v1397_v27, %v1395_v16 }
0x211f   :  { %v1827_v35 = vsub.f32 %v3695_v0, %v1826_v25  ;;  %v1399_v36 = vsel %vm524_vm11, %v1398_v32, 0.0  ;;  %v962_v54 = vsel %vm524_vm11, %v961_v28, 0.0 }
0x2120   :  { %1400 = vst [vmem:[#allocation2 + $0x2] sm:$0x1] %v1399_v36  ;;  %963 = vst [vmem:[#allocation2 + $0x1] sm:$0x1] %v962_v54 }
0x2121   :  { %v1834_v37 = vsel %vm520_vm9, %v1827_v35, %v1829_v41 }
0x2122   :  { %v1835_v42 = vsel %vm522_vm10, %v1834_v37, %v1832_v2 }
0x2123   :  { %v1836_v44 = vsel %vm524_vm11, %v1835_v42, 0.0 }
0x2124   :  { %1837 = vst [vmem:[#allocation2 + $0x3] sm:$0x1] %v1836_v44 }
0x2176   :  { %v2261_v47 = vpop.xlane.xlu1 %2260 }
0x2177   :  { %3095 = vlog2.f32 %v2261_v47 }
0x217a   :  { %v2269_v52 = vpop.permute.xlu1 %2268 }
0x2181   :  { %v3096_v48 = vpop.eup %3095 }
0x2182   :  { %v2263_v59 = vmul.f32 0.6931472, %v3096_v48 }
0x2184   :  { %v2264_v50 = vsub.f32 %v2256_v40, %v2263_v59 }
0x2186   :  { %v2271_v51 = vsel %vm520_vm9, %v2264_v50, %v2266_v21 }
0x2187   :  { %v2272_v55 = vsel %vm522_vm10, %v2271_v51, %v2269_v52 }
0x2188   :  { %v2273_v60 = vsel %vm524_vm11, %v2272_v55, 0.0 }
0x2189   :  { %2274 = vst [vmem:[#allocation2 + $0x4] sm:$0x1] %v2273_v60 }
0x218a   :  { %3108 = shalt.err (!%p3105_p4)
}
0x218b   :  { %s3109_s1 = scalar_lea.hbm %s3749_s11, 128 }
0x218c   :  { %p3110_p5 = scmp.ne.s32.totalorder %s3749_s11, %s3109_s1  ;;  %p3113_p6 = scmp.lt.u32.totalorder %s3109_s1, %s3749_s11 }
0x218e   :  { %p3115_p7 = pnand %p3113_p6, %p3110_p5 }
0x2190   :  { %3118 = shalt.err (!%p3115_p7)
}
0x2191   :  { %2284 = dma.vmem_to_hbm [thread:$0]  %s2282_s2, 128, %s3749_s11, [#allocation3]  }
0x2192   :  { %3119 = dma.done.wait [#allocation3], 128  }
0x2193   :  { %3120 = vsyncadd [#allocation3], 4294967168 }
0x2194   :  { %2288 = vsyncpa [#allocation3], 1 }

</bundles_post_ra>
